<compile_context>
chip_gen: v7x
topology: tpu7x:2x2x1
jax: 0.10.0
libtpu: 0.0.40
codegen_flags: <defaults>
</compile_context>

<pallas_src>
import math
import functools

import jax
import jax.numpy as jnp
from jax import lax
from jax.experimental import pallas as pl
from jax.experimental.pallas import tpu as pltpu

_BF16 = 2
_F32 = 4


def _layer_norm_f32(x, g, b, eps=1e-6):
    # PyTorch nn.LayerNorm (eps=1e-6 per PreSumm): biased variance over last dim.
    mu = jnp.mean(x, axis=-1, keepdims=True)
    var = jnp.mean((x - mu) ** 2, axis=-1, keepdims=True)
    return (x - mu) * lax.rsqrt(var + eps) * g + b


def _gelu_exact(x):
    # PreSumm gelu: 0.5 * x * (1 + erf(x / sqrt(2)))
    return 0.5 * x * (1.0 + lax.erf(x * (1.0 / math.sqrt(2.0))))


def _softmax_last(x):
    m = jnp.max(x, axis=-1, keepdims=True)
    e = jnp.exp(x - m)
    return e * pl.reciprocal(jnp.sum(e, axis=-1, keepdims=True), approx=True)


def encoder_layer_kernel(
    xq_ref, xf_ref, mask_ref,
    ln1_g_ref, ln1_b_ref,
    wq_ref, bq_ref, wk_ref, bk_ref, wv_ref, bv_ref,
    wo_ref, bo_ref,
    ln2_g_ref, ln2_b_ref,
    w1_ref, b1_ref, w2_ref, b2_ref,
    o_ref,
    kT_sc, v_sc, ctx_sc, yn_sc, acc_sc,
    *, apply_input_ln, heads,
):
    q_idx = pl.program_id(1)
    f_idx = pl.program_id(2)

    # ---------------- attention + residual (only once per (b, q-tile)) -----------------
    @pl.when(f_idx == 0)
    def _attention_block():
        # K/V cache: full-sequence LayerNorm + K/V projections, once per batch element.
        # Valid across all q-tiles because the q axis is "arbitrary" (not megacore-split).
        @pl.when(q_idx == 0)
        def _cache_kv():
            xf = xf_ref[0]                                            # (S, D) f32
            if apply_input_ln:
                kn = _layer_norm_f32(xf, ln1_g_ref[...], ln1_b_ref[...])
            else:
                kn = xf
            kn16 = kn.astype(jnp.bfloat16)
            k = jnp.dot(kn16, wk_ref[...],
                        preferred_element_type=jnp.float32) + bk_ref[...]
            v = jnp.dot(kn16, wv_ref[...],
                        preferred_element_type=jnp.float32) + bv_ref[...]
            # K stored transposed so the per-head QK^T needs no per-head transpose.
            kT_sc[...] = k.T.astype(jnp.bfloat16)                     # (D, S)
            v_sc[...] = v.astype(jnp.bfloat16)                        # (S, D)

        xq = xq_ref[0]                                                # (TQ, D) f32
        TQ, D = xq.shape
        dh = D // heads
        scale = 1.0 / math.sqrt(dh)

        if apply_input_ln:
            qn = _layer_norm_f32(xq, ln1_g_ref[...], ln1_b_ref[...])
        else:
            qn = xq

        # Full-width Q projection on the MXU, f32 accumulate; 1/sqrt(dh) folded in once.
        q = (jnp.dot(qn.astype(jnp.bfloat16), wq_ref[...],
                     preferred_element_type=jnp.float32) + bq_ref[...]) * scale
        q16 = q.astype(jnp.bfloat16)

        # Additive mask bias, computed once per q-tile (not per head).
        # Fully-masked rows degenerate to uniform attention, matching PyTorch
        # masked_fill(-1e18) + softmax.
        neg = jnp.where(mask_ref[0] > 0.0, jnp.float32(-1e18), jnp.float32(0.0))  # (1, S)

        # Per-head attention; context slabs land in a bf16 VMEM scratch so the output
        # projection runs as one full-K (TQ, D) @ (D, D) matmul (no f32 vreg accumulator).
        for h in range(heads):                                        # static unroll
            sl = slice(h * dh, (h + 1) * dh)
            s = jnp.dot(q16[:, sl], kT_sc[sl, :],
                        preferred_element_type=jnp.float32) + neg     # (TQ, S)
            p = _softmax_last(s)                                      # f32 softmax
            ctx = jnp.dot(p.astype(jnp.bfloat16), v_sc[:, sl],
                          preferred_element_type=jnp.float32)         # (TQ, dh)
            ctx_sc[:, sl] = ctx.astype(jnp.bfloat16)

        attn = jnp.dot(ctx_sc[...], wo_ref[...],
                       preferred_element_type=jnp.float32)            # (TQ, D)

        # dropout(context) is identity in eval mode
        out = attn + bo_ref[...] + xq                                 # (TQ, D) f32

        yn_sc[...] = _layer_norm_f32(out, ln2_g_ref[...], ln2_b_ref[...]).astype(jnp.bfloat16)
        acc_sc[...] = out + b2_ref[...]   # fold FFN residual + final bias into accumulator

    # ---------------- feed-forward; f axis tiles d_ff (n_f == 1 when resident) ---------
    h1 = _gelu_exact(
        jnp.dot(yn_sc[...], w1_ref[...], preferred_element_type=jnp.float32) + b1_ref[...]
    )
    acc_sc[...] += jnp.dot(h1.astype(jnp.bfloat16), w2_ref[...],
                           preferred_element_type=jnp.float32)

    @pl.when(f_idx == pl.num_programs(2) - 1)
    def _finalize():
        o_ref[0] = acc_sc[...].astype(o_ref.dtype)


def _divisor_tile(n, candidates):
    for c in candidates:
        if c <= n and n % c == 0:
            return c
    return n


def _vmem_capacity_bytes():
    try:
        return int(pltpu.get_tpu_info().vmem_capacity_bytes)
    except Exception:
        return 64 * 2**20   # conservative fallback: v7x per-TensorCore VMEM


def _footprint_bytes(S, D, d_ff, TQ, TF):
    """Rough VMEM footprint estimate for a (TQ, TF) tiling choice."""
    full_ffn = (TF == d_ff)
    consts = (4 * D * D * _BF16              # wq / wk / wv / wo
              + 4 * D * _F32                 # bq / bk / bv / bo
              + 5 * D * _F32)                # ln1_g/b, ln2_g/b, b2
    if full_ffn:
        consts += 2 * D * d_ff * _BF16 + d_ff * _F32          # w1, w2, b1 resident
        streamed_ffn = 0
    else:
        streamed_ffn = 2 * (D * TF * _BF16 + TF * D * _BF16 + TF * _F32)
    streamed = (2 * TQ * D * _F32            # xq tile (double-buffered)
                + S * D * _F32               # xf (single-buffered)
                + 2 * S * _F32               # mask
                + 2 * TQ * D * _F32          # output tile buffers
                + streamed_ffn)
    scratch = (D * S * _BF16 + S * D * _BF16                   # K^T, V caches
               + 2 * TQ * D * _BF16                            # ctx, yn
               + TQ * D * _F32)                                # acc
    live_attn = (3 * S * D + 3 * TQ * D + 2 * TQ * S) * _F32
    live_ffn = 2 * TQ * TF * _F32
    return consts + streamed + scratch + max(live_attn, live_ffn)


def transformer_encoder_layer(iter_, x, mask, params, heads):
    """x: (B,S,D) f32, mask: (B,1,S) f32 (1.0 = pad/masked). iter_ is static."""
    B, S, D = x.shape
    d_ff = params["w1"].shape[1]

    # --- generation-aware VMEM budget: ~80% of physical (≈51 MiB v7x, ≈102 MiB v5e/v6e)
    vmem_phys = _vmem_capacity_bytes()
    vmem_budget = int(0.8 * vmem_phys)

    # Query tile: 256 on 128-MiB parts (v5e/v6e), 128 on v7x; d_ff tile: prefer fully
    # resident FFN weights, fall back to 128-multiples only if they do not fit.
    tq_pref = (256, 128, 64, 32, 16, 8) if vmem_phys > 96 * 2**20 else (128, 64, 32, 16, 8)
    tf_pref = (d_ff, 2048, 1024, 512, 256, 128)

    TQ = TF = None
    for tq in tq_pref:
        if tq > S or S % tq:
            continue
        for tf in tf_pref:
            if tf > d_ff or d_ff % tf:
                continue
            if 1.2 * _footprint_bytes(S, D, d_ff, tq, tf) <= vmem_budget:
                TQ, TF = tq, tf
                break
        if TQ is not None:
            break
    if TQ is None:   # pathological shapes: smallest legal tiles
        TQ = _divisor_tile(S, (8,))
        TF = _divisor_tile(d_ff, (128,))
    n_q = S // TQ
    n_f = d_ff // TF

    single = pl.Buffered(1)   # blocks that are (nearly) never re-fetched: no double-buffer

    def const_spec(shape):
        return pl.BlockSpec(shape, lambda b, q, f, _n=len(shape): (0,) * _n,
                            pipeline_mode=single)

    # Full-sequence x (K/V source): its block index only changes with b (outermost axis),
    # so single-buffer it — halves the dominant streamed f32 buffer.
    xf_spec = pl.BlockSpec((1, S, D), lambda b, q, f: (b, 0, 0), pipeline_mode=single)

    if n_f == 1:   # FFN weights fully resident: DMA'd once per pallas_call
        w1_spec = const_spec((D, d_ff))
        b1_spec = const_spec((1, d_ff))
        w2_spec = const_spec((d_ff, D))
    else:          # tiled fallback along the d_ff reduction axis
        w1_spec = pl.BlockSpec((D, TF), lambda b, q, f: (0, f))
        b1_spec = pl.BlockSpec((1, TF), lambda b, q, f: (0, f))
        w2_spec = pl.BlockSpec((TF, D), lambda b, q, f: (f, 0))

    in_specs = [
        pl.BlockSpec((1, TQ, D), lambda b, q, f: (b, q, 0)),      # x : query/residual tile
        xf_spec,                                                  # x : full sequence (K/V)
        pl.BlockSpec((1, 1, S), lambda b, q, f: (b, 0, 0)),       # mask
        const_spec((1, D)), const_spec((1, D)),                   # ln1_g, ln1_b
        const_spec((D, D)), const_spec((1, D)),                   # wq, bq
        const_spec((D, D)), const_spec((1, D)),                   # wk, bk
        const_spec((D, D)), const_spec((1, D)),                   # wv, bv
        const_spec((D, D)), const_spec((1, D)),                   # wo, bo
        const_spec((1, D)), const_spec((1, D)),                   # ln2_g, ln2_b
        w1_spec, b1_spec, w2_spec,                                # w1, b1, w2
        const_spec((1, D)),                                       # b2
    ]

    kernel = functools.partial(
        encoder_layer_kernel, apply_input_ln=(iter_ != 0), heads=heads
    )

    return pl.pallas_call(
        kernel,
        out_shape=jax.ShapeDtypeStruct((B, S, D), x.dtype),
        grid=(B, n_q, n_f),
        in_specs=in_specs,
        out_specs=pl.BlockSpec((1, TQ, D), lambda b, q, f: (b, q, 0)),
        scratch_shapes=[
            pltpu.VMEM((D, S), jnp.bfloat16),    # K^T cache (per batch element)
            pltpu.VMEM((S, D), jnp.bfloat16),    # V cache (per batch element)
            pltpu.VMEM((TQ, D), jnp.bfloat16),   # head-concatenated context
            pltpu.VMEM((TQ, D), jnp.bfloat16),   # LayerNorm(out) for the FFN matmuls
            pltpu.VMEM((TQ, D), jnp.float32),    # FFN accumulator (+ residual + b2)
        ],
        compiler_params=pltpu.CompilerParams(
            # b parallel (megacore); q must stay "arbitrary" so the per-batch K/V cache
            # written at q == 0 is valid for all q-tiles; f is the d_ff reduction axis.
            dimension_semantics=("parallel", "arbitrary", "arbitrary"),
            vmem_limit_bytes=vmem_budget,
        ),
    )(x, x, mask,
      params["ln1_g"], params["ln1_b"],
      params["wq"], params["bq"], params["wk"], params["bk"],
      params["wv"], params["bv"], params["wo"], params["bo"],
      params["ln2_g"], params["ln2_b"],
      params["w1"], params["b1"], params["w2"], params["b2"])


def init_params(key, d_model, d_ff):
    ks = jax.random.split(key, 6)
    s = 0.05

    def w(k, shape):  # matmul weights stored bf16 (MXU-native); f32 accumulation in-kernel
        return (s * jax.random.normal(k, shape, jnp.float32)).astype(jnp.bfloat16)

    return {
        "ln1_g": jnp.ones((1, d_model), jnp.float32),
        "ln1_b": jnp.zeros((1, d_model), jnp.float32),
        "wq": w(ks[0], (d_model, d_model)), "bq": jnp.zeros((1, d_model), jnp.float32),
        "wk": w(ks[1], (d_model, d_model)), "bk": jnp.zeros((1, d_model), jnp.float32),
        "wv": w(ks[2], (d_model, d_model)), "bv": jnp.zeros((1, d_model), jnp.float32),
        "wo": w(ks[3], (d_model, d_model)), "bo": jnp.zeros((1, d_model), jnp.float32),
        "ln2_g": jnp.ones((1, d_model), jnp.float32),
        "ln2_b": jnp.zeros((1, d_model), jnp.float32),
        "w1": w(ks[4], (d_model, d_ff)), "b1": jnp.zeros((1, d_ff), jnp.float32),
        "w2": w(ks[5], (d_ff, d_model)), "b2": jnp.zeros((1, d_model), jnp.float32),
    }


if __name__ == "__main__":
    B, S, D, H, FF = 2, 8, 32, 4, 64

    key = jax.random.PRNGKey(0)
    k_x, k_p = jax.random.split(key)

    x = jax.random.normal(k_x, (B, S, D), jnp.float32)

    # mask: 1.0 = padded (masked out), 0.0 = real token. Pad last 2 tokens of batch 1.
    mask = jnp.zeros((B, 1, S), jnp.float32)
    mask = mask.at[1, 0, S - 2:].set(1.0)

    params = init_params(k_p, D, FF)

    # iter != 0 path (applies the pre-attention LayerNorm); dropout is eval-mode identity.
    out = transformer_encoder_layer(1, x, mask, params, heads=H)
    jax.block_until_ready(out)

    # also exercise the iter == 0 path once
    out0 = transformer_encoder_layer(0, x, mask, params, heads=H)
    jax.block_until_ready(out0)

    assert out.shape == (B, S, D) and out0.shape == (B, S, D)
    assert bool(jnp.all(jnp.isfinite(out))) and bool(jnp.all(jnp.isfinite(out0)))
    print("KERNEL_OK")
</pallas_src>

<mosaic_0001>
module attributes {stable_mosaic.version = 11 : i64} {
  func.func @encoder_layer_kernel(%arg0: i32, %arg1: i32, %arg2: i32, %arg3: memref<1x8x32xf32, #tpu.memory_space<vmem>>, %arg4: memref<1x8x32xf32, #tpu.memory_space<vmem>>, %arg5: memref<1x1x8xf32, #tpu.memory_space<vmem>>, %arg6: memref<1x32xf32, #tpu.memory_space<vmem>>, %arg7: memref<1x32xf32, #tpu.memory_space<vmem>>, %arg8: memref<32x32xbf16, #tpu.memory_space<vmem>>, %arg9: memref<1x32xf32, #tpu.memory_space<vmem>>, %arg10: memref<32x32xbf16, #tpu.memory_space<vmem>>, %arg11: memref<1x32xf32, #tpu.memory_space<vmem>>, %arg12: memref<32x32xbf16, #tpu.memory_space<vmem>>, %arg13: memref<1x32xf32, #tpu.memory_space<vmem>>, %arg14: memref<32x32xbf16, #tpu.memory_space<vmem>>, %arg15: memref<1x32xf32, #tpu.memory_space<vmem>>, %arg16: memref<1x32xf32, #tpu.memory_space<vmem>>, %arg17: memref<1x32xf32, #tpu.memory_space<vmem>>, %arg18: memref<32x64xbf16, #tpu.memory_space<vmem>>, %arg19: memref<1x64xf32, #tpu.memory_space<vmem>>, %arg20: memref<64x32xbf16, #tpu.memory_space<vmem>>, %arg21: memref<1x32xf32, #tpu.memory_space<vmem>>, %arg22: memref<1x8x32xf32, #tpu.memory_space<vmem>>, %arg23: memref<32x8xbf16, #tpu.memory_space<vmem>>, %arg24: memref<8x32xbf16, #tpu.memory_space<vmem>>, %arg25: memref<8x32xbf16, #tpu.memory_space<vmem>>, %arg26: memref<8x32xbf16, #tpu.memory_space<vmem>>, %arg27: memref<8x32xf32, #tpu.memory_space<vmem>>) attributes {dimension_semantics = [#tpu.dimension_semantics<parallel>, #tpu.dimension_semantics<arbitrary>, #tpu.dimension_semantics<arbitrary>], iteration_bounds = array<i64: 2, 1, 1>, scalar_prefetch = 0 : i64, scratch_operands = 5 : i64, tpu.core_type = #tpu.core_type<tc>, window_params = [{transform_indices = @transform_0, window_bounds = array<i64: 1, 8, 32>}, {pipeline_mode = #tpu.pipeline_mode<synchronous>, transform_indices = @transform_1, window_bounds = array<i64: 1, 8, 32>}, {transform_indices = @transform_2, window_bounds = array<i64: 1, 1, 8>}, {pipeline_mode = #tpu.pipeline_mode<synchronous>, transform_indices = @transform_3, window_bounds = array<i64: 1, 32>}, {pipeline_mode = #tpu.pipeline_mode<synchronous>, transform_indices = @transform_4, window_bounds = array<i64: 1, 32>}, {pipeline_mode = #tpu.pipeline_mode<synchronous>, transform_indices = @transform_5, window_bounds = array<i64: 32, 32>}, {pipeline_mode = #tpu.pipeline_mode<synchronous>, transform_indices = @transform_6, window_bounds = array<i64: 1, 32>}, {pipeline_mode = #tpu.pipeline_mode<synchronous>, transform_indices = @transform_7, window_bounds = array<i64: 32, 32>}, {pipeline_mode = #tpu.pipeline_mode<synchronous>, transform_indices = @transform_8, window_bounds = array<i64: 1, 32>}, {pipeline_mode = #tpu.pipeline_mode<synchronous>, transform_indices = @transform_9, window_bounds = array<i64: 32, 32>}, {pipeline_mode = #tpu.pipeline_mode<synchronous>, transform_indices = @transform_10, window_bounds = array<i64: 1, 32>}, {pipeline_mode = #tpu.pipeline_mode<synchronous>, transform_indices = @transform_11, window_bounds = array<i64: 32, 32>}, {pipeline_mode = #tpu.pipeline_mode<synchronous>, transform_indices = @transform_12, window_bounds = array<i64: 1, 32>}, {pipeline_mode = #tpu.pipeline_mode<synchronous>, transform_indices = @transform_13, window_bounds = array<i64: 1, 32>}, {pipeline_mode = #tpu.pipeline_mode<synchronous>, transform_indices = @transform_14, window_bounds = array<i64: 1, 32>}, {pipeline_mode = #tpu.pipeline_mode<synchronous>, transform_indices = @transform_15, window_bounds = array<i64: 32, 64>}, {pipeline_mode = #tpu.pipeline_mode<synchronous>, transform_indices = @transform_16, window_bounds = array<i64: 1, 64>}, {pipeline_mode = #tpu.pipeline_mode<synchronous>, transform_indices = @transform_17, window_bounds = array<i64: 64, 32>}, {pipeline_mode = #tpu.pipeline_mode<synchronous>, transform_indices = @transform_18, window_bounds = array<i64: 1, 32>}, {transform_indices = @transform_19, window_bounds = array<i64: 1, 8, 32>}]} {
    %c0_i32 = arith.constant 0 : i32
    %0 = arith.cmpi eq, %arg2, %c0_i32 : i32
    %1 = arith.extui %0 : i1 to i32
    %c0_i32_0 = arith.constant 0 : i32
    %2 = arith.cmpi ne, %1, %c0_i32_0 : i32
    scf.if %2 {
      %c0_i32_18 = arith.constant 0 : i32
      %26 = arith.cmpi eq, %arg1, %c0_i32_18 : i32
      %27 = arith.extui %26 : i1 to i32
      %c0_i32_19 = arith.constant 0 : i32
      %28 = arith.cmpi ne, %27, %c0_i32_19 : i32
      scf.if %28 {
        %c0_103 = arith.constant 0 : index
        %c0_104 = arith.constant 0 : index
        %c0_105 = arith.constant 0 : index
        %188 = vector.load %arg4[%c0_103, %c0_104, %c0_105] : memref<1x8x32xf32, #tpu.memory_space<vmem>>, vector<1x8x32xf32>
        %189 = vector.shape_cast %188 : vector<1x8x32xf32> to vector<8x32xf32>
        %c0_106 = arith.constant 0 : index
        %c0_107 = arith.constant 0 : index
        %190 = vector.load %arg6[%c0_106, %c0_107] : memref<1x32xf32, #tpu.memory_space<vmem>>, vector<1x32xf32>
        %c0_108 = arith.constant 0 : index
        %c0_109 = arith.constant 0 : index
        %191 = vector.load %arg7[%c0_108, %c0_109] : memref<1x32xf32, #tpu.memory_space<vmem>>, vector<1x32xf32>
        %cst_110 = arith.constant dense<0.000000e+00> : vector<8xf32>
        %192 = vector.multi_reduction <add>, %189, %cst_110 [1] : vector<8x32xf32> to vector<8xf32>
        %193 = vector.shape_cast %192 : vector<8xf32> to vector<8x1xf32>
        %cst_111 = arith.constant 3.200000e+01 : f32
        %194 = vector.broadcast %cst_111 : f32 to vector<8x1xf32>
        %195 = arith.divf %193, %194 : vector<8x1xf32>
        %196 = vector.broadcast %195 : vector<8x1xf32> to vector<8x32xf32>
        %197 = arith.subf %189, %196 : vector<8x32xf32>
        %198 = arith.mulf %197, %197 : vector<8x32xf32>
        %cst_112 = arith.constant dense<0.000000e+00> : vector<8xf32>
        %199 = vector.multi_reduction <add>, %198, %cst_112 [1] : vector<8x32xf32> to vector<8xf32>
        %200 = vector.shape_cast %199 : vector<8xf32> to vector<8x1xf32>
        %cst_113 = arith.constant 3.200000e+01 : f32
        %201 = vector.broadcast %cst_113 : f32 to vector<8x1xf32>
        %202 = arith.divf %200, %201 : vector<8x1xf32>
        %203 = vector.broadcast %195 : vector<8x1xf32> to vector<8x32xf32>
        %204 = arith.subf %189, %203 : vector<8x32xf32>
        %cst_114 = arith.constant 9.99999997E-7 : f32
        %205 = vector.broadcast %cst_114 : f32 to vector<8x1xf32>
        %206 = arith.addf %202, %205 : vector<8x1xf32>
        %207 = math.rsqrt %206 : vector<8x1xf32>
        %208 = vector.broadcast %207 : vector<8x1xf32> to vector<8x32xf32>
        %209 = arith.mulf %204, %208 : vector<8x32xf32>
        %210 = vector.broadcast %190 : vector<1x32xf32> to vector<8x32xf32>
        %211 = arith.mulf %209, %210 : vector<8x32xf32>
        %212 = vector.broadcast %191 : vector<1x32xf32> to vector<8x32xf32>
        %213 = arith.addf %211, %212 : vector<8x32xf32>
        %214 = arith.truncf %213 : vector<8x32xf32> to vector<8x32xbf16>
        %c0_115 = arith.constant 0 : index
        %c0_116 = arith.constant 0 : index
        %215 = vector.load %arg10[%c0_115, %c0_116] : memref<32x32xbf16, #tpu.memory_space<vmem>>, vector<32x32xbf16>
        %cst_117 = arith.constant dense<0.000000e+00> : vector<8x32xf32>
        %216 = tpu.matmul %214, %215, %cst_117 {dimension_numbers = #tpu.dot_dimension_numbers<[1], [0], [0], [1], [0, 0, 1, 1], [], []>} : vector<8x32xbf16>, vector<32x32xbf16>, vector<8x32xf32> -> vector<8x32xf32>
        %c0_118 = arith.constant 0 : index
        %c0_119 = arith.constant 0 : index
        %217 = vector.load %arg11[%c0_118, %c0_119] : memref<1x32xf32, #tpu.memory_space<vmem>>, vector<1x32xf32>
        %218 = vector.broadcast %217 : vector<1x32xf32> to vector<8x32xf32>
        %219 = arith.addf %216, %218 : vector<8x32xf32>
        %c0_120 = arith.constant 0 : index
        %c0_121 = arith.constant 0 : index
        %220 = vector.load %arg12[%c0_120, %c0_121] : memref<32x32xbf16, #tpu.memory_space<vmem>>, vector<32x32xbf16>
        %cst_122 = arith.constant dense<0.000000e+00> : vector<8x32xf32>
        %221 = tpu.matmul %214, %220, %cst_122 {dimension_numbers = #tpu.dot_dimension_numbers<[1], [0], [0], [1], [0, 0, 1, 1], [], []>} : vector<8x32xbf16>, vector<32x32xbf16>, vector<8x32xf32> -> vector<8x32xf32>
        %c0_123 = arith.constant 0 : index
        %c0_124 = arith.constant 0 : index
        %222 = vector.load %arg13[%c0_123, %c0_124] : memref<1x32xf32, #tpu.memory_space<vmem>>, vector<1x32xf32>
        %223 = vector.broadcast %222 : vector<1x32xf32> to vector<8x32xf32>
        %224 = arith.addf %221, %223 : vector<8x32xf32>
        %225 = tpu.transpose %219, [1, 0] : vector<8x32xf32> -> vector<32x8xf32>
        %226 = arith.truncf %225 : vector<32x8xf32> to vector<32x8xbf16>
        %c0_125 = arith.constant 0 : index
        %c0_126 = arith.constant 0 : index
        %227 = vector.load %arg23[%c0_125, %c0_126] : memref<32x8xbf16, #tpu.memory_space<vmem>>, vector<32x8xbf16>
        tpu.vector_store %arg23[%c0_125, %c0_126], %226 {strides = array<i32>} : memref<32x8xbf16, #tpu.memory_space<vmem>>, vector<32x8xbf16>,
        %228 = arith.truncf %224 : vector<8x32xf32> to vector<8x32xbf16>
        %c0_127 = arith.constant 0 : index
        %c0_128 = arith.constant 0 : index
        %229 = vector.load %arg24[%c0_127, %c0_128] : memref<8x32xbf16, #tpu.memory_space<vmem>>, vector<8x32xbf16>
        tpu.vector_store %arg24[%c0_127, %c0_128], %228 {strides = array<i32>} : memref<8x32xbf16, #tpu.memory_space<vmem>>, vector<8x32xbf16>,
      } else {
      }
      %c0_20 = arith.constant 0 : index
      %c0_21 = arith.constant 0 : index
      %c0_22 = arith.constant 0 : index
      %29 = vector.load %arg3[%c0_20, %c0_21, %c0_22] : memref<1x8x32xf32, #tpu.memory_space<vmem>>, vector<1x8x32xf32>
      %30 = vector.shape_cast %29 : vector<1x8x32xf32> to vector<8x32xf32>
      %c0_23 = arith.constant 0 : index
      %c0_24 = arith.constant 0 : index
      %31 = vector.load %arg6[%c0_23, %c0_24] : memref<1x32xf32, #tpu.memory_space<vmem>>, vector<1x32xf32>
      %c0_25 = arith.constant 0 : index
      %c0_26 = arith.constant 0 : index
      %32 = vector.load %arg7[%c0_25, %c0_26] : memref<1x32xf32, #tpu.memory_space<vmem>>, vector<1x32xf32>
      %cst_27 = arith.constant dense<0.000000e+00> : vector<8xf32>
      %33 = vector.multi_reduction <add>, %30, %cst_27 [1] : vector<8x32xf32> to vector<8xf32>
      %34 = vector.shape_cast %33 : vector<8xf32> to vector<8x1xf32>
      %cst_28 = arith.constant 3.200000e+01 : f32
      %35 = vector.broadcast %cst_28 : f32 to vector<8x1xf32>
      %36 = arith.divf %34, %35 : vector<8x1xf32>
      %37 = vector.broadcast %36 : vector<8x1xf32> to vector<8x32xf32>
      %38 = arith.subf %30, %37 : vector<8x32xf32>
      %39 = arith.mulf %38, %38 : vector<8x32xf32>
      %cst_29 = arith.constant dense<0.000000e+00> : vector<8xf32>
      %40 = vector.multi_reduction <add>, %39, %cst_29 [1] : vector<8x32xf32> to vector<8xf32>
      %41 = vector.shape_cast %40 : vector<8xf32> to vector<8x1xf32>
      %cst_30 = arith.constant 3.200000e+01 : f32
      %42 = vector.broadcast %cst_30 : f32 to vector<8x1xf32>
      %43 = arith.divf %41, %42 : vector<8x1xf32>
      %44 = vector.broadcast %36 : vector<8x1xf32> to vector<8x32xf32>
      %45 = arith.subf %30, %44 : vector<8x32xf32>
      %cst_31 = arith.constant 9.99999997E-7 : f32
      %46 = vector.broadcast %cst_31 : f32 to vector<8x1xf32>
      %47 = arith.addf %43, %46 : vector<8x1xf32>
      %48 = math.rsqrt %47 : vector<8x1xf32>
      %49 = vector.broadcast %48 : vector<8x1xf32> to vector<8x32xf32>
      %50 = arith.mulf %45, %49 : vector<8x32xf32>
      %51 = vector.broadcast %31 : vector<1x32xf32> to vector<8x32xf32>
      %52 = arith.mulf %50, %51 : vector<8x32xf32>
      %53 = vector.broadcast %32 : vector<1x32xf32> to vector<8x32xf32>
      %54 = arith.addf %52, %53 : vector<8x32xf32>
      %55 = arith.truncf %54 : vector<8x32xf32> to vector<8x32xbf16>
      %c0_32 = arith.constant 0 : index
      %c0_33 = arith.constant 0 : index
      %56 = vector.load %arg8[%c0_32, %c0_33] : memref<32x32xbf16, #tpu.memory_space<vmem>>, vector<32x32xbf16>
      %cst_34 = arith.constant dense<0.000000e+00> : vector<8x32xf32>
      %57 = tpu.matmul %55, %56, %cst_34 {dimension_numbers = #tpu.dot_dimension_numbers<[1], [0], [0], [1], [0, 0, 1, 1], [], []>} : vector<8x32xbf16>, vector<32x32xbf16>, vector<8x32xf32> -> vector<8x32xf32>
      %c0_35 = arith.constant 0 : index
      %c0_36 = arith.constant 0 : index
      %58 = vector.load %arg9[%c0_35, %c0_36] : memref<1x32xf32, #tpu.memory_space<vmem>>, vector<1x32xf32>
      %59 = vector.broadcast %58 : vector<1x32xf32> to vector<8x32xf32>
      %60 = arith.addf %57, %59 : vector<8x32xf32>
      %cst_37 = arith.constant 0.353553385 : f32
      %61 = vector.broadcast %cst_37 : f32 to vector<8x32xf32>
      %62 = arith.mulf %60, %61 : vector<8x32xf32>
      %63 = arith.truncf %62 : vector<8x32xf32> to vector<8x32xbf16>
      %c0_38 = arith.constant 0 : index
      %c0_39 = arith.constant 0 : index
      %c0_40 = arith.constant 0 : index
      %64 = vector.load %arg5[%c0_38, %c0_39, %c0_40] : memref<1x1x8xf32, #tpu.memory_space<vmem>>, vector<1x1x8xf32>
      %65 = vector.shape_cast %64 : vector<1x1x8xf32> to vector<1x8xf32>
      %cst_41 = arith.constant 0.000000e+00 : f32
      %66 = vector.broadcast %cst_41 : f32 to vector<1x8xf32>
      %67 = arith.cmpf ogt, %65, %66 : vector<1x8xf32>
      %cst_42 = arith.constant -9.99999984E+17 : f32
      %cst_43 = arith.constant 0.000000e+00 : f32
      %68 = vector.broadcast %cst_42 : f32 to vector<1x8xf32>
      %69 = vector.broadcast %cst_43 : f32 to vector<1x8xf32>
      %70 = arith.select %67, %68, %69 : vector<1x8xi1>, vector<1x8xf32>
      %71 = vector.extract_strided_slice %63 {offsets = [0, 0], sizes = [8, 8], strides = [1, 1]} : vector<8x32xbf16> to vector<8x8xbf16>
      %c0_44 = arith.constant 0 : index
      %c0_45 = arith.constant 0 : index
      %72 = vector.load %arg23[%c0_44, %c0_45] : memref<32x8xbf16, #tpu.memory_space<vmem>>, vector<8x8xbf16>
      %cst_46 = arith.constant dense<0.000000e+00> : vector<8x8xf32>
      %73 = tpu.matmul %71, %72, %cst_46 {dimension_numbers = #tpu.dot_dimension_numbers<[1], [0], [0], [1], [0, 0, 1, 1], [], []>} : vector<8x8xbf16>, vector<8x8xbf16>, vector<8x8xf32> -> vector<8x8xf32>
      %74 = vector.broadcast %70 : vector<1x8xf32> to vector<8x8xf32>
      %75 = arith.addf %73, %74 : vector<8x8xf32>
      %cst_47 = arith.constant dense<0xFF800000> : vector<8xf32>
      %76 = vector.multi_reduction <maximumf>, %75, %cst_47 [1] : vector<8x8xf32> to vector<8xf32>
      %77 = vector.shape_cast %76 : vector<8xf32> to vector<8x1xf32>
      %78 = vector.broadcast %77 : vector<8x1xf32> to vector<8x8xf32>
      %79 = arith.subf %75, %78 : vector<8x8xf32>
      %80 = math.exp %79 : vector<8x8xf32>
      %cst_48 = arith.constant dense<0.000000e+00> : vector<8xf32>
      %81 = vector.multi_reduction <add>, %80, %cst_48 [1] : vector<8x8xf32> to vector<8xf32>
      %82 = vector.shape_cast %81 : vector<8xf32> to vector<8x1xf32>
      %83 = tpu.reciprocal %82 {approx = true} : vector<8x1xf32> -> vector<8x1xf32>
      %84 = vector.broadcast %83 : vector<8x1xf32> to vector<8x8xf32>
      %85 = arith.mulf %80, %84 : vector<8x8xf32>
      %86 = arith.truncf %85 : vector<8x8xf32> to vector<8x8xbf16>
      %c0_49 = arith.constant 0 : index
      %c0_50 = arith.constant 0 : index
      %87 = vector.load %arg24[%c0_49, %c0_50] : memref<8x32xbf16, #tpu.memory_space<vmem>>, vector<8x8xbf16>
      %cst_51 = arith.constant dense<0.000000e+00> : vector<8x8xf32>
      %88 = tpu.matmul %86, %87, %cst_51 {dimension_numbers = #tpu.dot_dimension_numbers<[1], [0], [0], [1], [0, 0, 1, 1], [], []>} : vector<8x8xbf16>, vector<8x8xbf16>, vector<8x8xf32> -> vector<8x8xf32>
      %89 = arith.truncf %88 : vector<8x8xf32> to vector<8x8xbf16>
      %c0_52 = arith.constant 0 : index
      %c0_53 = arith.constant 0 : index
      %90 = vector.load %arg25[%c0_52, %c0_53] : memref<8x32xbf16, #tpu.memory_space<vmem>>, vector<8x8xbf16>
      tpu.vector_store %arg25[%c0_52, %c0_53], %89 {strides = array<i32>} : memref<8x32xbf16, #tpu.memory_space<vmem>>, vector<8x8xbf16>,
      %91 = vector.extract_strided_slice %63 {offsets = [0, 8], sizes = [8, 8], strides = [1, 1]} : vector<8x32xbf16> to vector<8x8xbf16>
      %c8 = arith.constant 8 : index
      %c0_54 = arith.constant 0 : index
      %92 = vector.load %arg23[%c8, %c0_54] : memref<32x8xbf16, #tpu.memory_space<vmem>>, vector<8x8xbf16>
      %cst_55 = arith.constant dense<0.000000e+00> : vector<8x8xf32>
      %93 = tpu.matmul %91, %92, %cst_55 {dimension_numbers = #tpu.dot_dimension_numbers<[1], [0], [0], [1], [0, 0, 1, 1], [], []>} : vector<8x8xbf16>, vector<8x8xbf16>, vector<8x8xf32> -> vector<8x8xf32>
      %94 = vector.broadcast %70 : vector<1x8xf32> to vector<8x8xf32>
      %95 = arith.addf %93, %94 : vector<8x8xf32>
      %cst_56 = arith.constant dense<0xFF800000> : vector<8xf32>
      %96 = vector.multi_reduction <maximumf>, %95, %cst_56 [1] : vector<8x8xf32> to vector<8xf32>
      %97 = vector.shape_cast %96 : vector<8xf32> to vector<8x1xf32>
      %98 = vector.broadcast %97 : vector<8x1xf32> to vector<8x8xf32>
      %99 = arith.subf %95, %98 : vector<8x8xf32>
      %100 = math.exp %99 : vector<8x8xf32>
      %cst_57 = arith.constant dense<0.000000e+00> : vector<8xf32>
      %101 = vector.multi_reduction <add>, %100, %cst_57 [1] : vector<8x8xf32> to vector<8xf32>
      %102 = vector.shape_cast %101 : vector<8xf32> to vector<8x1xf32>
      %103 = tpu.reciprocal %102 {approx = true} : vector<8x1xf32> -> vector<8x1xf32>
      %104 = vector.broadcast %103 : vector<8x1xf32> to vector<8x8xf32>
      %105 = arith.mulf %100, %104 : vector<8x8xf32>
      %106 = arith.truncf %105 : vector<8x8xf32> to vector<8x8xbf16>
      %c0_58 = arith.constant 0 : index
      %c8_59 = arith.constant 8 : index
      %107 = vector.load %arg24[%c0_58, %c8_59] : memref<8x32xbf16, #tpu.memory_space<vmem>>, vector<8x8xbf16>
      %cst_60 = arith.constant dense<0.000000e+00> : vector<8x8xf32>
      %108 = tpu.matmul %106, %107, %cst_60 {dimension_numbers = #tpu.dot_dimension_numbers<[1], [0], [0], [1], [0, 0, 1, 1], [], []>} : vector<8x8xbf16>, vector<8x8xbf16>, vector<8x8xf32> -> vector<8x8xf32>
      %109 = arith.truncf %108 : vector<8x8xf32> to vector<8x8xbf16>
      %c0_61 = arith.constant 0 : index
      %c8_62 = arith.constant 8 : index
      %110 = vector.load %arg25[%c0_61, %c8_62] : memref<8x32xbf16, #tpu.memory_space<vmem>>, vector<8x8xbf16>
      tpu.vector_store %arg25[%c0_61, %c8_62], %109 {strides = array<i32>} : memref<8x32xbf16, #tpu.memory_space<vmem>>, vector<8x8xbf16>,
      %111 = vector.extract_strided_slice %63 {offsets = [0, 16], sizes = [8, 8], strides = [1, 1]} : vector<8x32xbf16> to vector<8x8xbf16>
      %c16 = arith.constant 16 : index
      %c0_63 = arith.constant 0 : index
      %112 = vector.load %arg23[%c16, %c0_63] : memref<32x8xbf16, #tpu.memory_space<vmem>>, vector<8x8xbf16>
      %cst_64 = arith.constant dense<0.000000e+00> : vector<8x8xf32>
      %113 = tpu.matmul %111, %112, %cst_64 {dimension_numbers = #tpu.dot_dimension_numbers<[1], [0], [0], [1], [0, 0, 1, 1], [], []>} : vector<8x8xbf16>, vector<8x8xbf16>, vector<8x8xf32> -> vector<8x8xf32>
      %114 = vector.broadcast %70 : vector<1x8xf32> to vector<8x8xf32>
      %115 = arith.addf %113, %114 : vector<8x8xf32>
      %cst_65 = arith.constant dense<0xFF800000> : vector<8xf32>
      %116 = vector.multi_reduction <maximumf>, %115, %cst_65 [1] : vector<8x8xf32> to vector<8xf32>
      %117 = vector.shape_cast %116 : vector<8xf32> to vector<8x1xf32>
      %118 = vector.broadcast %117 : vector<8x1xf32> to vector<8x8xf32>
      %119 = arith.subf %115, %118 : vector<8x8xf32>
      %120 = math.exp %119 : vector<8x8xf32>
      %cst_66 = arith.constant dense<0.000000e+00> : vector<8xf32>
      %121 = vector.multi_reduction <add>, %120, %cst_66 [1] : vector<8x8xf32> to vector<8xf32>
      %122 = vector.shape_cast %121 : vector<8xf32> to vector<8x1xf32>
      %123 = tpu.reciprocal %122 {approx = true} : vector<8x1xf32> -> vector<8x1xf32>
      %124 = vector.broadcast %123 : vector<8x1xf32> to vector<8x8xf32>
      %125 = arith.mulf %120, %124 : vector<8x8xf32>
      %126 = arith.truncf %125 : vector<8x8xf32> to vector<8x8xbf16>
      %c0_67 = arith.constant 0 : index
      %c16_68 = arith.constant 16 : index
      %127 = vector.load %arg24[%c0_67, %c16_68] : memref<8x32xbf16, #tpu.memory_space<vmem>>, vector<8x8xbf16>
      %cst_69 = arith.constant dense<0.000000e+00> : vector<8x8xf32>
      %128 = tpu.matmul %126, %127, %cst_69 {dimension_numbers = #tpu.dot_dimension_numbers<[1], [0], [0], [1], [0, 0, 1, 1], [], []>} : vector<8x8xbf16>, vector<8x8xbf16>, vector<8x8xf32> -> vector<8x8xf32>
      %129 = arith.truncf %128 : vector<8x8xf32> to vector<8x8xbf16>
      %c0_70 = arith.constant 0 : index
      %c16_71 = arith.constant 16 : index
      %130 = vector.load %arg25[%c0_70, %c16_71] : memref<8x32xbf16, #tpu.memory_space<vmem>>, vector<8x8xbf16>
      tpu.vector_store %arg25[%c0_70, %c16_71], %129 {strides = array<i32>} : memref<8x32xbf16, #tpu.memory_space<vmem>>, vector<8x8xbf16>,
      %131 = vector.extract_strided_slice %63 {offsets = [0, 24], sizes = [8, 8], strides = [1, 1]} : vector<8x32xbf16> to vector<8x8xbf16>
      %c24 = arith.constant 24 : index
      %c0_72 = arith.constant 0 : index
      %132 = vector.load %arg23[%c24, %c0_72] : memref<32x8xbf16, #tpu.memory_space<vmem>>, vector<8x8xbf16>
      %cst_73 = arith.constant dense<0.000000e+00> : vector<8x8xf32>
      %133 = tpu.matmul %131, %132, %cst_73 {dimension_numbers = #tpu.dot_dimension_numbers<[1], [0], [0], [1], [0, 0, 1, 1], [], []>} : vector<8x8xbf16>, vector<8x8xbf16>, vector<8x8xf32> -> vector<8x8xf32>
      %134 = vector.broadcast %70 : vector<1x8xf32> to vector<8x8xf32>
      %135 = arith.addf %133, %134 : vector<8x8xf32>
      %cst_74 = arith.constant dense<0xFF800000> : vector<8xf32>
      %136 = vector.multi_reduction <maximumf>, %135, %cst_74 [1] : vector<8x8xf32> to vector<8xf32>
      %137 = vector.shape_cast %136 : vector<8xf32> to vector<8x1xf32>
      %138 = vector.broadcast %137 : vector<8x1xf32> to vector<8x8xf32>
      %139 = arith.subf %135, %138 : vector<8x8xf32>
      %140 = math.exp %139 : vector<8x8xf32>
      %cst_75 = arith.constant dense<0.000000e+00> : vector<8xf32>
      %141 = vector.multi_reduction <add>, %140, %cst_75 [1] : vector<8x8xf32> to vector<8xf32>
      %142 = vector.shape_cast %141 : vector<8xf32> to vector<8x1xf32>
      %143 = tpu.reciprocal %142 {approx = true} : vector<8x1xf32> -> vector<8x1xf32>
      %144 = vector.broadcast %143 : vector<8x1xf32> to vector<8x8xf32>
      %145 = arith.mulf %140, %144 : vector<8x8xf32>
      %146 = arith.truncf %145 : vector<8x8xf32> to vector<8x8xbf16>
      %c0_76 = arith.constant 0 : index
      %c24_77 = arith.constant 24 : index
      %147 = vector.load %arg24[%c0_76, %c24_77] : memref<8x32xbf16, #tpu.memory_space<vmem>>, vector<8x8xbf16>
      %cst_78 = arith.constant dense<0.000000e+00> : vector<8x8xf32>
      %148 = tpu.matmul %146, %147, %cst_78 {dimension_numbers = #tpu.dot_dimension_numbers<[1], [0], [0], [1], [0, 0, 1, 1], [], []>} : vector<8x8xbf16>, vector<8x8xbf16>, vector<8x8xf32> -> vector<8x8xf32>
      %149 = arith.truncf %148 : vector<8x8xf32> to vector<8x8xbf16>
      %c0_79 = arith.constant 0 : index
      %c24_80 = arith.constant 24 : index
      %150 = vector.load %arg25[%c0_79, %c24_80] : memref<8x32xbf16, #tpu.memory_space<vmem>>, vector<8x8xbf16>
      tpu.vector_store %arg25[%c0_79, %c24_80], %149 {strides = array<i32>} : memref<8x32xbf16, #tpu.memory_space<vmem>>, vector<8x8xbf16>,
      %c0_81 = arith.constant 0 : index
      %c0_82 = arith.constant 0 : index
      %151 = vector.load %arg25[%c0_81, %c0_82] : memref<8x32xbf16, #tpu.memory_space<vmem>>, vector<8x32xbf16>
      %c0_83 = arith.constant 0 : index
      %c0_84 = arith.constant 0 : index
      %152 = vector.load %arg14[%c0_83, %c0_84] : memref<32x32xbf16, #tpu.memory_space<vmem>>, vector<32x32xbf16>
      %cst_85 = arith.constant dense<0.000000e+00> : vector<8x32xf32>
      %153 = tpu.matmul %151, %152, %cst_85 {dimension_numbers = #tpu.dot_dimension_numbers<[1], [0], [0], [1], [0, 0, 1, 1], [], []>} : vector<8x32xbf16>, vector<32x32xbf16>, vector<8x32xf32> -> vector<8x32xf32>
      %c0_86 = arith.constant 0 : index
      %c0_87 = arith.constant 0 : index
      %154 = vector.load %arg15[%c0_86, %c0_87] : memref<1x32xf32, #tpu.memory_space<vmem>>, vector<1x32xf32>
      %155 = vector.broadcast %154 : vector<1x32xf32> to vector<8x32xf32>
      %156 = arith.addf %153, %155 : vector<8x32xf32>
      %157 = arith.addf %156, %30 : vector<8x32xf32>
      %c0_88 = arith.constant 0 : index
      %c0_89 = arith.constant 0 : index
      %158 = vector.load %arg16[%c0_88, %c0_89] : memref<1x32xf32, #tpu.memory_space<vmem>>, vector<1x32xf32>
      %c0_90 = arith.constant 0 : index
      %c0_91 = arith.constant 0 : index
      %159 = vector.load %arg17[%c0_90, %c0_91] : memref<1x32xf32, #tpu.memory_space<vmem>>, vector<1x32xf32>
      %cst_92 = arith.constant dense<0.000000e+00> : vector<8xf32>
      %160 = vector.multi_reduction <add>, %157, %cst_92 [1] : vector<8x32xf32> to vector<8xf32>
      %161 = vector.shape_cast %160 : vector<8xf32> to vector<8x1xf32>
      %cst_93 = arith.constant 3.200000e+01 : f32
      %162 = vector.broadcast %cst_93 : f32 to vector<8x1xf32>
      %163 = arith.divf %161, %162 : vector<8x1xf32>
      %164 = vector.broadcast %163 : vector<8x1xf32> to vector<8x32xf32>
      %165 = arith.subf %157, %164 : vector<8x32xf32>
      %166 = arith.mulf %165, %165 : vector<8x32xf32>
      %cst_94 = arith.constant dense<0.000000e+00> : vector<8xf32>
      %167 = vector.multi_reduction <add>, %166, %cst_94 [1] : vector<8x32xf32> to vector<8xf32>
      %168 = vector.shape_cast %167 : vector<8xf32> to vector<8x1xf32>
      %cst_95 = arith.constant 3.200000e+01 : f32
      %169 = vector.broadcast %cst_95 : f32 to vector<8x1xf32>
      %170 = arith.divf %168, %169 : vector<8x1xf32>
      %171 = vector.broadcast %163 : vector<8x1xf32> to vector<8x32xf32>
      %172 = arith.subf %157, %171 : vector<8x32xf32>
      %cst_96 = arith.constant 9.99999997E-7 : f32
      %173 = vector.broadcast %cst_96 : f32 to vector<8x1xf32>
      %174 = arith.addf %170, %173 : vector<8x1xf32>
      %175 = math.rsqrt %174 : vector<8x1xf32>
      %176 = vector.broadcast %175 : vector<8x1xf32> to vector<8x32xf32>
      %177 = arith.mulf %172, %176 : vector<8x32xf32>
      %178 = vector.broadcast %158 : vector<1x32xf32> to vector<8x32xf32>
      %179 = arith.mulf %177, %178 : vector<8x32xf32>
      %180 = vector.broadcast %159 : vector<1x32xf32> to vector<8x32xf32>
      %181 = arith.addf %179, %180 : vector<8x32xf32>
      %182 = arith.truncf %181 : vector<8x32xf32> to vector<8x32xbf16>
      %c0_97 = arith.constant 0 : index
      %c0_98 = arith.constant 0 : index
      %183 = vector.load %arg26[%c0_97, %c0_98] : memref<8x32xbf16, #tpu.memory_space<vmem>>, vector<8x32xbf16>
      tpu.vector_store %arg26[%c0_97, %c0_98], %182 {strides = array<i32>} : memref<8x32xbf16, #tpu.memory_space<vmem>>, vector<8x32xbf16>,
      %c0_99 = arith.constant 0 : index
      %c0_100 = arith.constant 0 : index
      %184 = vector.load %arg21[%c0_99, %c0_100] : memref<1x32xf32, #tpu.memory_space<vmem>>, vector<1x32xf32>
      %185 = vector.broadcast %184 : vector<1x32xf32> to vector<8x32xf32>
      %186 = arith.addf %157, %185 : vector<8x32xf32>
      %c0_101 = arith.constant 0 : index
      %c0_102 = arith.constant 0 : index
      %187 = vector.load %arg27[%c0_101, %c0_102] : memref<8x32xf32, #tpu.memory_space<vmem>>, vector<8x32xf32>
      tpu.vector_store %arg27[%c0_101, %c0_102], %186 {strides = array<i32>} : memref<8x32xf32, #tpu.memory_space<vmem>>, vector<8x32xf32>,
    } else {
    }
    %c0 = arith.constant 0 : index
    %c0_1 = arith.constant 0 : index
    %3 = vector.load %arg26[%c0, %c0_1] : memref<8x32xbf16, #tpu.memory_space<vmem>>, vector<8x32xbf16>
    %c0_2 = arith.constant 0 : index
    %c0_3 = arith.constant 0 : index
    %4 = vector.load %arg18[%c0_2, %c0_3] : memref<32x64xbf16, #tpu.memory_space<vmem>>, vector<32x64xbf16>
    %cst = arith.constant dense<0.000000e+00> : vector<8x64xf32>
    %5 = tpu.matmul %3, %4, %cst {dimension_numbers = #tpu.dot_dimension_numbers<[1], [0], [0], [1], [0, 0, 1, 1], [], []>} : vector<8x32xbf16>, vector<32x64xbf16>, vector<8x64xf32> -> vector<8x64xf32>
    %c0_4 = arith.constant 0 : index
    %c0_5 = arith.constant 0 : index
    %6 = vector.load %arg19[%c0_4, %c0_5] : memref<1x64xf32, #tpu.memory_space<vmem>>, vector<1x64xf32>
    %7 = vector.broadcast %6 : vector<1x64xf32> to vector<8x64xf32>
    %8 = arith.addf %5, %7 : vector<8x64xf32>
    %cst_6 = arith.constant 5.000000e-01 : f32
    %9 = vector.broadcast %cst_6 : f32 to vector<8x64xf32>
    %10 = arith.mulf %9, %8 : vector<8x64xf32>
    %cst_7 = arith.constant 0.707106769 : f32
    %11 = vector.broadcast %cst_7 : f32 to vector<8x64xf32>
    %12 = arith.mulf %8, %11 : vector<8x64xf32>
    %13 = math.erf %12 : vector<8x64xf32>
    %cst_8 = arith.constant 1.000000e+00 : f32
    %14 = vector.broadcast %cst_8 : f32 to vector<8x64xf32>
    %15 = arith.addf %14, %13 : vector<8x64xf32>
    %16 = arith.mulf %10, %15 : vector<8x64xf32>
    %c0_9 = arith.constant 0 : index
    %c0_10 = arith.constant 0 : index
    %17 = vector.load %arg27[%c0_9, %c0_10] : memref<8x32xf32, #tpu.memory_space<vmem>>, vector<8x32xf32>
    %18 = arith.truncf %16 : vector<8x64xf32> to vector<8x64xbf16>
    %c0_11 = arith.constant 0 : index
    %c0_12 = arith.constant 0 : index
    %19 = vector.load %arg20[%c0_11, %c0_12] : memref<64x32xbf16, #tpu.memory_space<vmem>>, vector<64x32xbf16>
    %cst_13 = arith.constant dense<0.000000e+00> : vector<8x32xf32>
    %20 = tpu.matmul %18, %19, %cst_13 {dimension_numbers = #tpu.dot_dimension_numbers<[1], [0], [0], [1], [0, 0, 1, 1], [], []>} : vector<8x64xbf16>, vector<64x32xbf16>, vector<8x32xf32> -> vector<8x32xf32>
    %21 = arith.addf %17, %20 : vector<8x32xf32>
    %c0_14 = arith.constant 0 : index
    %c0_15 = arith.constant 0 : index
    %22 = vector.load %arg27[%c0_14, %c0_15] : memref<8x32xf32, #tpu.memory_space<vmem>>, vector<8x32xf32>
    tpu.vector_store %arg27[%c0_14, %c0_15], %21 {strides = array<i32>} : memref<8x32xf32, #tpu.memory_space<vmem>>, vector<8x32xf32>,
    %c0_i32_16 = arith.constant 0 : i32
    %23 = arith.cmpi eq, %arg2, %c0_i32_16 : i32
    %24 = arith.extui %23 : i1 to i32
    %c0_i32_17 = arith.constant 0 : i32
    %25 = arith.cmpi ne, %24, %c0_i32_17 : i32
    scf.if %25 {
      %c0_18 = arith.constant 0 : index
      %c0_19 = arith.constant 0 : index
      %26 = vector.load %arg27[%c0_18, %c0_19] : memref<8x32xf32, #tpu.memory_space<vmem>>, vector<8x32xf32>
      %c0_20 = arith.constant 0 : index
      %c0_21 = arith.constant 0 : index
      %c0_22 = arith.constant 0 : index
      %27 = vector.load %arg22[%c0_20, %c0_21, %c0_22] : memref<1x8x32xf32, #tpu.memory_space<vmem>>, vector<1x8x32xf32>
      %28 = vector.shape_cast %27 : vector<1x8x32xf32> to vector<8x32xf32>
      %29 = vector.shape_cast %26 : vector<8x32xf32> to vector<1x8x32xf32>
      tpu.vector_store %arg22[%c0_20, %c0_21, %c0_22], %29 {strides = array<i32>} : memref<1x8x32xf32, #tpu.memory_space<vmem>>, vector<1x8x32xf32>,
    } else {
    }
    return
  }
  func.func @transform_0(%arg0: i32, %arg1: i32, %arg2: i32) -> (i32, i32, i32) {
    %c0_i32 = arith.constant 0 : i32
    %c0_i32_0 = arith.constant 0 : i32
    return %arg0, %arg1, %c0_i32 : i32, i32, i32
  }
  func.func @transform_1(%arg0: i32, %arg1: i32, %arg2: i32) -> (i32, i32, i32) {
    %c0_i32 = arith.constant 0 : i32
    %c0_i32_0 = arith.constant 0 : i32
    %c0_i32_1 = arith.constant 0 : i32
    return %arg0, %c0_i32, %c0_i32_0 : i32, i32, i32
  }
  func.func @transform_2(%arg0: i32, %arg1: i32, %arg2: i32) -> (i32, i32, i32) {
    %c0_i32 = arith.constant 0 : i32
    %c0_i32_0 = arith.constant 0 : i32
    %c0_i32_1 = arith.constant 0 : i32
    return %arg0, %c0_i32, %c0_i32_0 : i32, i32, i32
  }
  func.func @transform_3(%arg0: i32, %arg1: i32, %arg2: i32) -> (i32, i32) {
    %c0_i32 = arith.constant 0 : i32
    %c0_i32_0 = arith.constant 0 : i32
    %c0_i32_1 = arith.constant 0 : i32
    return %c0_i32, %c0_i32_0 : i32, i32
  }
  func.func @transform_4(%arg0: i32, %arg1: i32, %arg2: i32) -> (i32, i32) {
    %c0_i32 = arith.constant 0 : i32
    %c0_i32_0 = arith.constant 0 : i32
    %c0_i32_1 = arith.constant 0 : i32
    return %c0_i32, %c0_i32_0 : i32, i32
  }
  func.func @transform_5(%arg0: i32, %arg1: i32, %arg2: i32) -> (i32, i32) {
    %c0_i32 = arith.constant 0 : i32
    %c0_i32_0 = arith.constant 0 : i32
    %c0_i32_1 = arith.constant 0 : i32
    return %c0_i32, %c0_i32_0 : i32, i32
  }
  func.func @transform_6(%arg0: i32, %arg1: i32, %arg2: i32) -> (i32, i32) {
    %c0_i32 = arith.constant 0 : i32
    %c0_i32_0 = arith.constant 0 : i32
    %c0_i32_1 = arith.constant 0 : i32
    return %c0_i32, %c0_i32_0 : i32, i32
  }
  func.func @transform_7(%arg0: i32, %arg1: i32, %arg2: i32) -> (i32, i32) {
    %c0_i32 = arith.constant 0 : i32
    %c0_i32_0 = arith.constant 0 : i32
    %c0_i32_1 = arith.constant 0 : i32
    return %c0_i32, %c0_i32_0 : i32, i32
  }
  func.func @transform_8(%arg0: i32, %arg1: i32, %arg2: i32) -> (i32, i32) {
    %c0_i32 = arith.constant 0 : i32
    %c0_i32_0 = arith.constant 0 : i32
    %c0_i32_1 = arith.constant 0 : i32
    return %c0_i32, %c0_i32_0 : i32, i32
  }
  func.func @transform_9(%arg0: i32, %arg1: i32, %arg2: i32) -> (i32, i32) {
    %c0_i32 = arith.constant 0 : i32
    %c0_i32_0 = arith.constant 0 : i32
    %c0_i32_1 = arith.constant 0 : i32
    return %c0_i32, %c0_i32_0 : i32, i32
  }
  func.func @transform_10(%arg0: i32, %arg1: i32, %arg2: i32) -> (i32, i32) {
    %c0_i32 = arith.constant 0 : i32
    %c0_i32_0 = arith.constant 0 : i32
    %c0_i32_1 = arith.constant 0 : i32
    return %c0_i32, %c0_i32_0 : i32, i32
  }
  func.func @transform_11(%arg0: i32, %arg1: i32, %arg2: i32) -> (i32, i32) {
    %c0_i32 = arith.constant 0 : i32
    %c0_i32_0 = arith.constant 0 : i32
    %c0_i32_1 = arith.constant 0 : i32
    return %c0_i32, %c0_i32_0 : i32, i32
  }
  func.func @transform_12(%arg0: i32, %arg1: i32, %arg2: i32) -> (i32, i32) {
    %c0_i32 = arith.constant 0 : i32
    %c0_i32_0 = arith.constant 0 : i32
    %c0_i32_1 = arith.constant 0 : i32
    return %c0_i32, %c0_i32_0 : i32, i32
  }
  func.func @transform_13(%arg0: i32, %arg1: i32, %arg2: i32) -> (i32, i32) {
    %c0_i32 = arith.constant 0 : i32
    %c0_i32_0 = arith.constant 0 : i32
    %c0_i32_1 = arith.constant 0 : i32
    return %c0_i32, %c0_i32_0 : i32, i32
  }
  func.func @transform_14(%arg0: i32, %arg1: i32, %arg2: i32) -> (i32, i32) {
    %c0_i32 = arith.constant 0 : i32
    %c0_i32_0 = arith.constant 0 : i32
    %c0_i32_1 = arith.constant 0 : i32
    return %c0_i32, %c0_i32_0 : i32, i32
  }
  func.func @transform_15(%arg0: i32, %arg1: i32, %arg2: i32) -> (i32, i32) {
    %c0_i32 = arith.constant 0 : i32
    %c0_i32_0 = arith.constant 0 : i32
    %c0_i32_1 = arith.constant 0 : i32
    return %c0_i32, %c0_i32_0 : i32, i32
  }
  func.func @transform_16(%arg0: i32, %arg1: i32, %arg2: i32) -> (i32, i32) {
    %c0_i32 = arith.constant 0 : i32
    %c0_i32_0 = arith.constant 0 : i32
    %c0_i32_1 = arith.constant 0 : i32
    return %c0_i32, %c0_i32_0 : i32, i32
  }
  func.func @transform_17(%arg0: i32, %arg1: i32, %arg2: i32) -> (i32, i32) {
    %c0_i32 = arith.constant 0 : i32
    %c0_i32_0 = arith.constant 0 : i32
    %c0_i32_1 = arith.constant 0 : i32
    return %c0_i32, %c0_i32_0 : i32, i32
  }
  func.func @transform_18(%arg0: i32, %arg1: i32, %arg2: i32) -> (i32, i32) {
    %c0_i32 = arith.constant 0 : i32
    %c0_i32_0 = arith.constant 0 : i32
    %c0_i32_1 = arith.constant 0 : i32
    return %c0_i32, %c0_i32_0 : i32, i32
  }
  func.func @transform_19(%arg0: i32, %arg1: i32, %arg2: i32) -> (i32, i32, i32) {
    %c0_i32 = arith.constant 0 : i32
    %c0_i32_0 = arith.constant 0 : i32
    return %arg0, %arg1, %c0_i32 : i32, i32, i32
  }
}

</mosaic_0001>

<bundles_post_ra>
// kernel: tpu_custom_call.1
= control target key start
LH: loop header
LB: loop body
LE: loop exit
PB: predicated region body
PF: predicated region fallthrough
CT: control target
= control target key end

     0   :  { %s3468_s0 = inlined_call_operand.vmem [shape: f32[2,8,32], index: 0, kind: input, shape index: {}]   ;;  %s3469_s1 = inlined_call_operand.vmem [shape: f32[2,8,32], index: 1, kind: input, shape index: {}]   ;;  %s3470_s2 = inlined_call_operand.hbm [shape: f32[2,1,8], index: 2, kind: input, shape index: {}]   ;;  %s3471_s3 = inlined_call_operand.vmem [shape: f32[1,32], index: 3, kind: input, shape index: {}]   ;;  %s3472_s4 = inlined_call_operand.hbm [shape: f32[1,32], index: 4, kind: input, shape index: {}]   ;;  %s3473_s5 = inlined_call_operand.vmem [shape: bf16[32,32], index: 5, kind: input, shape index: {}]   ;;  %s3474_s6 = inlined_call_operand.hbm [shape: f32[1,32], index: 6, kind: input, shape index: {}]   ;;  %s3475_s7 = inlined_call_operand.hbm [shape: bf16[32,32], index: 7, kind: input, shape index: {}]   ;;  %s3476_s8 = inlined_call_operand.hbm [shape: f32[1,32], index: 8, kind: input, shape index: {}]   ;;  %s3477_s9 = inlined_call_operand.vmem [shape: bf16[32,32], index: 9, kind: input, shape index: {}]   ;;  %s3478_s10 = inlined_call_operand.hbm [shape: f32[1,32], index: 10, kind: input, shape index: {}]   ;;  %s3479_s11 = inlined_call_operand.hbm [shape: bf16[32,32], index: 11, kind: input, shape index: {}]   ;;  %s3480_s12 = inlined_call_operand.hbm [shape: f32[1,32], index: 12, kind: input, shape index: {}]   ;;  %s3481_s13 = inlined_call_operand.hbm [shape: f32[1,32], index: 13, kind: input, shape index: {}]   ;;  %s3482_s14 = inlined_call_operand.vmem [shape: f32[1,32], index: 14, kind: input, shape index: {}]   ;;  %s3483_s15 = inlined_call_operand.vmem [shape: bf16[32,64], index: 15, kind: input, shape index: {}]   ;;  %s3484_s16 = inlined_call_operand.vmem [shape: f32[1,64], index: 16, kind: input, shape index: {}]   ;;  %s3485_s17 = inlined_call_operand.vmem [shape: bf16[64,32], index: 17, kind: input, shape index: {}]   ;;  %s3486_s18 = inlined_call_operand.vmem [shape: f32[1,32], index: 18, kind: input, shape index: {}]   ;;  %s3487_s19 = inlined_call_operand.hbm [shape: f32[2,8,32], index: 19, kind: output, shape index: {}]  }
   0x1   :  { %3500 = sst [smem:[#allocation29_spill]] %s3468_s0 }
   0x2   :  { %3501 = sst [smem:[#allocation30_spill]] %s3469_s1 }
   0x3   :  { %3502 = sst [smem:[#allocation31_spill]] %s3470_s2 }
   0x4   :  { %3503 = sst [smem:[#allocation32_spill]] %s3471_s3 }
   0x5   :  { %3504 = sst [smem:[#allocation33_spill]] %s3472_s4 }
   0x6   :  { %3505 = sst [smem:[#allocation34_spill]] %s3473_s5 }
   0x7   :  { %3506 = sst [smem:[#allocation35_spill]] %s3474_s6 }
   0x8   :  { %3507 = sst [smem:[#allocation36_spill]] %s3475_s7 }
   0x9   :  { %3508 = sst [smem:[#allocation37_spill]] %s3482_s14 }
   0xa   :  { %3509 = sst [smem:[#allocation38_spill]] %s3483_s15 }
   0xb   :  { %3510 = sst [smem:[#allocation39_spill]] %s3484_s16 }
   0xc   :  { %3511 = sst [smem:[#allocation40_spill]] %s3485_s17 }
   0xd   :  { %3512 = sst [smem:[#allocation41_spill]] %s3486_s18 }
   0xe   :  { %3513 = sst [smem:[#allocation42_spill]] %s3487_s19 }
   0xf   :  { %24 = vsyncpa [#allocation8], 0 }
  0x10   :  { %26 = vsyncpa [#allocation8 + $0x1], 0 }
  0x11   :  { %27 = vsyncpa [#allocation11], 0 }
  0x12   :  { %28 = vsyncpa [#allocation14], 0 }
  0x13   :  { %29 = vsyncpa [#allocation17], 0 }
  0x14   :  { %30 = vsyncpa [#allocation20], 0 }
  0x15   :  { %31 = vsyncpa [#allocation9], 0 }
  0x16   :  { %33 = vsyncpa [#allocation9 + $0x1], 0  ;;  %s2937_s0 = smov 0   ;;  %s2939_s30 = smov 0  }
  0x17   :  { %s2941_s20 = smov 0   ;;  %s2943_s21 = smov 0  }
  0x18   :  { %s2945_s1 = smov 0   ;;  %s2947_s22 = smov 0  }
  0x19 LB: > { %s3489_s2 = sadd.s32 4294967295, %s2815_s22   ;;  %p2057_p0 = scmp.ge.s32.totalorder %s2815_s22, 1  ;;  %s2815_s22 = sphi %s2947_s22, %s39_s22   ;;  %s2811_s1 = sphi %s2945_s1, %s3550_s1   ;;  %s2807_s21 = sphi %s2943_s21, %s3549_s21   ;;  %s2803_s20 = sphi %s2941_s20, %s3548_s20   ;;  %s2799_s30 = sphi %s2939_s30, %s3547_s30   ;;  %s2795_s0 = sphi %s2937_s0, %s3546_s0  }
  0x1a   : > { %p2971_p1 = scmp.eq.s32.totalorder %s3489_s2, 0  ;;  %p507_p2 = scmp.lt.s32.totalorder %s2815_s22, 3 }
  0x1b   : > { %s2817_s25 = smov [#allocation10]   ;;  %s2818_s26 = smov [#allocation13]  }
  0x1c   : > { %s3514_s23 = scalar_select %p2971_p1, 1, 0 }
  0x1d   : > { %p2976_p3 = pnand %p2057_p0, %p507_p2  ;;  %s530_s3 = sshll.u32 %s2817_s25, 4  ;;  %s531_s3 = int_to_ptr.vmem [resolvable:$true] %s530_s3 }
  0x1e   : > { %s554_s27 = sshll.u32 %s2818_s26, 4  ;;  %s2819_s29 = smov [#allocation16]   ;;  %s2989_s27 = int_to_ptr.vmem [resolvable:$true] %s554_s27 }
  0x1f   : > { %s3515_s24 = scalar_select %p2976_p3, 1, 0 }
  0x20   : > { %p2305_p5 = pneg %p2976_p3  ;;  %s2991_s2 = sshll.u32 %s2819_s29, 4  ;;  %s583_s2 = int_to_ptr.vmem [resolvable:$true] %s2991_s2 }
  0x21   : > { %s3517_s4 = sld [smem:[#allocation33_spill]] }
  0x22   : > { %p2985_p6 = pnand %p2305_p5, %p2971_p1 }
  0x24   : > { %p3001_p8 = pneg %p2985_p6 }
  0x27   : > { %s2463_s25 = scalar_lea.hbm %s3517_s4, 16 }
  0x28   : > { %p2464_p7 = scmp.ne.s32.totalorder %s3517_s4, %s2463_s25  ;;  %p2470_p11 = scmp.lt.u32.totalorder %s2463_s25, %s3517_s4 }
  0x2a   : > { %p2466_p9 = pnand %p3001_p8, %p2464_p7 }
  0x2c   : > { %p2467_p10 = pneg %p2466_p9 }
  0x2e   : > { %p2472_p12 = pnand %p2470_p11, %p2467_p10 }
  0x30   : > { %2475 = shalt.err (!%p2472_p12)
}
  0x31   : > { %s2476_s16 = scalar_lea.vmem %s531_s3, 16  ;;  %s2483_s14 = scalar_lea.vmem %s531_s3, 32 }
  0x32   : > { %p2477_p13 = scmp.ne.s32.totalorder %s531_s3, %s2476_s16  ;;  %p2484_p5 = scmp.lt.s32.totalorder %s531_s3, %s531_s3 }
  0x33   : > { %p2485_p4 = scmp.lt.s32.totalorder %s2483_s14, %s2476_s16 }
  0x34   : > { %p2479_p0 = pnand %p2477_p13, %p3001_p8 }
  0x35   : > { %p2486_p3 = por %p2485_p4, %p2484_p5 }
  0x36   : > { %p2480_p2 = pneg %p2479_p0 }
  0x38   : > { %p2487_p1 = pnand %p2486_p3, %p2480_p2 }
  0x3a   : > { %2490 = shalt.err (!%p2487_p1)
}
  0x3b   : > { %2308 = dma.hbm_to_vmem [thread:$0]  (!%p2985_p6), %s3517_s4, 16, %s531_s3, [#allocation11]  }
  0x3c   : > { %s3519_s7 = sld [smem:[#allocation36_spill]] }
  0x42   : > { %s2491_s29 = scalar_lea.hbm %s3519_s7, 256 }
  0x43   : > { %p2492_p7 = scmp.ne.s32.totalorder %s3519_s7, %s2491_s29  ;;  %p2498_p1 = scmp.lt.u32.totalorder %s2491_s29, %s3519_s7 }
  0x45   : > { %p2494_p9 = pnand %p2492_p7, %p3001_p8 }
  0x47   : > { %p2495_p4 = pneg %p2494_p9 }
  0x49   : > { %p2500_p3 = pnand %p2498_p1, %p2495_p4 }
  0x4b   : > { %2503 = shalt.err (!%p2500_p3)
}
  0x4c   : > { %s2504_s3 = scalar_lea.vmem %s2989_s27, 256  ;;  %p2512_p13 = scmp.lt.s32.totalorder %s2989_s27, %s2989_s27 }
  0x4d   : > { %p2505_p10 = scmp.ne.s32.totalorder %s2989_s27, %s2504_s3  ;;  %p2513_p0 = scmp.lt.s32.totalorder %s2504_s3, %s2504_s3 }
  0x4f   : > { %p2507_p11 = pnand %p2505_p10, %p3001_p8  ;;  %p2514_p2 = por %p2513_p0, %p2512_p13 }
  0x51   : > { %p2508_p12 = pneg %p2507_p11 }
  0x53   : > { %p2515_p5 = pnand %p2514_p2, %p2508_p12 }
  0x55   : > { %2518 = shalt.err (!%p2515_p5)
}
  0x56   : > { %s3497_s5 = smov 64   ;;  %s3498_s18 = smov 4  }
  0x57   : > { %2314 = dma.hbm_to_vmem [thread:$0]  (!%p2985_p6), %s3519_s7, 256, %s2989_s27, [#allocation14], %s3497_s5, %s3497_s5, %s3498_s18  }
  0x58   : > { %s2519_s29 = scalar_lea.hbm %s3478_s10, 16 }
  0x59   : > { %p2520_p7 = scmp.ne.s32.totalorder %s3478_s10, %s2519_s29  ;;  %p2526_p1 = scmp.lt.u32.totalorder %s2519_s29, %s3478_s10 }
  0x5b   : > { %p2522_p9 = pnand %p2520_p7, %p3001_p8 }
  0x5d   : > { %p2523_p4 = pneg %p2522_p9 }
  0x5f   : > { %p2528_p3 = pnand %p2526_p1, %p2523_p4 }
  0x61   : > { %2531 = shalt.err (!%p2528_p3)
}
  0x62   : > { %s2532_s17 = scalar_lea.vmem %s583_s2, 16  ;;  %s2539_s27 = scalar_lea.vmem %s583_s2, 32 }
  0x63   : > { %p2533_p10 = scmp.ne.s32.totalorder %s583_s2, %s2532_s17  ;;  %p2540_p13 = scmp.lt.s32.totalorder %s583_s2, %s583_s2 }
  0x64   : > { %p2541_p0 = scmp.lt.s32.totalorder %s2539_s27, %s2532_s17 }
  0x65   : > { %p2535_p11 = pnand %p2533_p10, %p3001_p8 }
  0x66   : > { %p2542_p2 = por %p2541_p0, %p2540_p13 }
  0x67   : > { %p2536_p12 = pneg %p2535_p11 }
  0x69   : > { %p2543_p5 = pnand %p2542_p2, %p2536_p12 }
  0x6b   : > { %2546 = shalt.err (!%p2543_p5)
}
  0x6c   : > { %2320 = dma.hbm_to_vmem [thread:$0]  (!%p2985_p6), %s3478_s10, 16, %s583_s2, [#allocation17]  }
  0x6d   : > { %s2822_s4 = smov [#allocation19]   ;;  %s2823_s29 = smov [#allocation12]  }
  0x6e   : > { %s606_s25 = sshll.u32 %s2822_s4, 4  ;;  %s544_s16 = sshll.u32 %s2823_s29, 4  ;;  %s607_s25 = int_to_ptr.vmem [resolvable:$true] %s606_s25  ;;  %s545_s16 = int_to_ptr.vmem [resolvable:$true] %s544_s16 }
  0x6f   : > { %s2547_s5 = scalar_lea.hbm %s3480_s12, 16 }
  0x70   : > { %p2548_p7 = scmp.ne.s32.totalorder %s3480_s12, %s2547_s5  ;;  %p2554_p1 = scmp.lt.u32.totalorder %s2547_s5, %s3480_s12 }
  0x72   : > { %p2550_p9 = pnand %p2548_p7, %p3001_p8 }
  0x74   : > { %p2551_p4 = pneg %p2550_p9 }
  0x76   : > { %p2556_p3 = pnand %p2554_p1, %p2551_p4 }
  0x78   : > { %2559 = shalt.err (!%p2556_p3)
}
  0x79   : > { %s2560_s2 = scalar_lea.vmem %s607_s25, 16  ;;  %s2567_s15 = scalar_lea.vmem %s607_s25, 32 }
  0x7a   : > { %p2561_p10 = scmp.ne.s32.totalorder %s607_s25, %s2560_s2  ;;  %p2568_p13 = scmp.lt.s32.totalorder %s607_s25, %s607_s25 }
  0x7b   : > { %p2569_p0 = scmp.lt.s32.totalorder %s2567_s15, %s2560_s2 }
  0x7c   : > { %p2563_p11 = pnand %p2561_p10, %p3001_p8 }
  0x7d   : > { %p2570_p2 = por %p2569_p0, %p2568_p13 }
  0x7e   : > { %p2564_p12 = pneg %p2563_p11 }
  0x80   : > { %p2571_p5 = pnand %p2570_p2, %p2564_p12 }
  0x82   : > { %2574 = shalt.err (!%p2571_p5)
}
  0x83   : > { %2326 = dma.hbm_to_vmem [thread:$0]  (!%p2985_p6), %s3480_s12, 16, %s607_s25, [#allocation20]  }
  0x84   : > { %s3520_s6 = sld [smem:[#allocation35_spill]] }
  0x8a   : > { %s2575_s14 = scalar_lea.hbm %s3520_s6, 16 }
  0x8b   : > { %p2576_p7 = scmp.ne.s32.totalorder %s3520_s6, %s2575_s14  ;;  %p2582_p1 = scmp.lt.u32.totalorder %s2575_s14, %s3520_s6 }
  0x8d   : > { %p2578_p9 = pnand %p2576_p7, %p3001_p8 }
  0x8f   : > { %p2579_p4 = pneg %p2578_p9 }
  0x91   : > { %p2584_p3 = pnand %p2582_p1, %p2579_p4 }
  0x93   : > { %2587 = shalt.err (!%p2584_p3)
}
  0x94   : > { %s2588_s2 = scalar_lea.vmem %s545_s16, 16  ;;  %s2595_s25 = scalar_lea.vmem %s545_s16, 32 }
  0x95   : > { %p2589_p10 = scmp.ne.s32.totalorder %s545_s16, %s2588_s2  ;;  %p2596_p13 = scmp.lt.s32.totalorder %s545_s16, %s545_s16 }
  0x96   : > { %p2597_p0 = scmp.lt.s32.totalorder %s2595_s25, %s2588_s2 }
  0x97   : > { %p2591_p11 = pnand %p2589_p10, %p3001_p8 }
  0x98   : > { %p2598_p2 = por %p2597_p0, %p2596_p13 }
  0x99   : > { %p2592_p12 = pneg %p2591_p11 }
  0x9b   : > { %p2599_p5 = pnand %p2598_p2, %p2592_p12 }
  0x9d   : > { %2602 = shalt.err (!%p2599_p5)
}
  0x9e   : > { %2311 = dma.hbm_to_vmem [thread:$0]  (!%p2985_p6), %s3520_s6, 16, %s545_s16, [#allocation11]  }
  0x9f   : > { %s2824_s29 = smov [#allocation15]   ;;  %s2825_s18 = smov [#allocation18]  }
  0xa0   : > { %s568_s5 = sshll.u32 %s2824_s29, 4  ;;  %s592_s14 = sshll.u32 %s2825_s18, 4  ;;  %s569_s5 = int_to_ptr.vmem [resolvable:$true] %s568_s5  ;;  %s593_s14 = int_to_ptr.vmem [resolvable:$true] %s592_s14 }
  0xa1   : > { %s2603_s27 = scalar_lea.hbm %s3476_s8, 16 }
  0xa2   : > { %p2604_p7 = scmp.ne.s32.totalorder %s3476_s8, %s2603_s27  ;;  %p2610_p1 = scmp.lt.u32.totalorder %s2603_s27, %s3476_s8 }
  0xa4   : > { %p2606_p9 = pnand %p2604_p7, %p3001_p8 }
  0xa6   : > { %p2607_p4 = pneg %p2606_p9 }
  0xa8   : > { %p2612_p3 = pnand %p2610_p1, %p2607_p4 }
  0xaa   : > { %2615 = shalt.err (!%p2612_p3)
}
  0xab   : > { %s2616_s16 = scalar_lea.vmem %s569_s5, 16  ;;  %s2623_s4 = scalar_lea.vmem %s569_s5, 32 }
  0xac   : > { %p2617_p10 = scmp.ne.s32.totalorder %s569_s5, %s2616_s16  ;;  %p2624_p13 = scmp.lt.s32.totalorder %s569_s5, %s569_s5 }
  0xad   : > { %p2625_p0 = scmp.lt.s32.totalorder %s2623_s4, %s2616_s16 }
  0xae   : > { %p2619_p11 = pnand %p2617_p10, %p3001_p8 }
  0xaf   : > { %p2626_p2 = por %p2625_p0, %p2624_p13 }
  0xb0   : > { %p2620_p12 = pneg %p2619_p11 }
  0xb2   : > { %p2627_p5 = pnand %p2626_p2, %p2620_p12 }
  0xb4   : > { %2630 = shalt.err (!%p2627_p5)
}
  0xb5   : > { %2317 = dma.hbm_to_vmem [thread:$0]  (!%p2985_p6), %s3476_s8, 16, %s569_s5, [#allocation14]  }
  0xb6   : > { %s2631_s27 = scalar_lea.hbm %s3479_s11, 256 }
  0xb7   : > { %p2632_p7 = scmp.ne.s32.totalorder %s3479_s11, %s2631_s27  ;;  %p2638_p1 = scmp.lt.u32.totalorder %s2631_s27, %s3479_s11 }
  0xb9   : > { %p2634_p9 = pnand %p2632_p7, %p3001_p8 }
  0xbb   : > { %p2635_p4 = pneg %p2634_p9 }
  0xbd   : > { %p2640_p3 = pnand %p2638_p1, %p2635_p4 }
  0xbf   : > { %2643 = shalt.err (!%p2640_p3)
}
  0xc0   : > { %s2644_s16 = scalar_lea.vmem %s593_s14, 256  ;;  %p2652_p13 = scmp.lt.s32.totalorder %s593_s14, %s593_s14 }
  0xc1   : > { %p2645_p10 = scmp.ne.s32.totalorder %s593_s14, %s2644_s16  ;;  %p2653_p0 = scmp.lt.s32.totalorder %s2644_s16, %s2644_s16 }
  0xc3   : > { %p2647_p11 = pnand %p2645_p10, %p3001_p8  ;;  %p2654_p2 = por %p2653_p0, %p2652_p13 }
  0xc5   : > { %p2648_p12 = pneg %p2647_p11 }
  0xc7   : > { %p2655_p5 = pnand %p2654_p2, %p2648_p12 }
  0xc9   : > { %2658 = shalt.err (!%p2655_p5)
}
  0xca   : > { %s3521_s5 = smov 4   ;;  %s3522_s4 = smov 64  }
  0xcb   : > { %2323 = dma.hbm_to_vmem [thread:$0]  (!%p2985_p6), %s3479_s11, 256, %s593_s14, [#allocation17], %s3522_s4, %s3522_s4, %s3521_s5  }
  0xcc   : > { %s2826_s3 = smov [#allocation21]   ;;  %s2659_s2 = scalar_lea.hbm %s3481_s13, 16 }
  0xcd   : > { %s617_s17 = sshll.u32 %s2826_s3, 4  ;;  %p2660_p7 = scmp.ne.s32.totalorder %s3481_s13, %s2659_s2  ;;  %s618_s17 = int_to_ptr.vmem [resolvable:$true] %s617_s17 }
  0xce   : > { %p2666_p1 = scmp.lt.u32.totalorder %s2659_s2, %s3481_s13 }
  0xcf   : > { %p2662_p9 = pnand %p2660_p7, %p3001_p8 }
  0xd1   : > { %p2663_p4 = pneg %p2662_p9 }
  0xd3   : > { %p2668_p3 = pnand %p2666_p1, %p2663_p4 }
  0xd5   : > { %2671 = shalt.err (!%p2668_p3)
}
  0xd6   : > { %s2672_s14 = scalar_lea.vmem %s618_s17, 16  ;;  %s2679_s5 = scalar_lea.vmem %s618_s17, 32 }
  0xd7   : > { %p2673_p10 = scmp.ne.s32.totalorder %s618_s17, %s2672_s14  ;;  %p2680_p13 = scmp.lt.s32.totalorder %s618_s17, %s618_s17 }
  0xd8   : > { %p2681_p0 = scmp.lt.s32.totalorder %s2679_s5, %s2672_s14 }
  0xd9   : > { %p2675_p11 = pnand %p2673_p10, %p3001_p8 }
  0xda   : > { %p2682_p2 = por %p2681_p0, %p2680_p13 }
  0xdb   : > { %p2676_p12 = pneg %p2675_p11 }
  0xdd   : > { %p2683_p5 = pnand %p2682_p2, %p2676_p12 }
  0xdf   : > { %2686 = shalt.err (!%p2683_p5)
}
  0xe0   : > { %2329 = dma.hbm_to_vmem [thread:$0]  (!%p2985_p6), %s3481_s13, 16, %s618_s17, [#allocation20]  }
  0xe1   : > { %s2056_s6 = sadd.s32 4294967294, %s2815_s22   ;;  %s58_s26 = sadd.s32 1, %s2811_s1 }
  0xe2   : > { %p60_p8 = scmp.ge.s32.totalorder %s58_s26, 2  ;;  %s119_s28 = sadd.s32 1, %s2803_s20 }
  0xe3   : > { %p126_p7 = scmp.ne.s32.totalorder %s2803_s20, %s2799_s30  ;;  %p127_p9 = scmp.eq.s32.totalorder %s2815_s22, 0 }
  0xe4   : > { %s3552_s26 = smov (%p60_p8, %s58_s26), 0  ;;  %p132_p1 = scmp.ne.s32.totalorder %s2799_s30, %s2795_s0 }
  0xe5   : > { %p3163_p4 = por %p127_p9, %p126_p7  ;;  %s116_s3 = ssub.s32 %s2811_s1, %s3552_s26 }
  0xe6   : > { %s3524_s17 = sadd.s32 4294967295, %s2815_s22   ;;  %p117_p3 = scmp.eq.s32.totalorder %s116_s3, 0 }
  0xe7   : > { %p494_p6 = scmp.eq.s32.totalorder %s3524_s17, 1  ;;  %p3525_p10 = scmp.ne.s32.totalorder %s3514_s23, 0 }
  0xe8   : > { %p500_p13 = scmp.eq.s32.totalorder %s2056_s6, 1  ;;  %p2346_p2 = scmp.lt.s32.totalorder %s2815_s22, 2 }
  0xe9   : > { %p3175_p11 = por %p3525_p10, %p132_p1  ;;  %p3179_p12 = por %p494_p6, %p126_p7 }
  0xea   : > { %s3184_s2 = scalar_select %p117_p3, %s2803_s20, %s119_s28  }
  0xeb   : > { %s3527_s19 = scalar_select %p3179_p12, 1, 0 }
  0xec   : > { %p3186_p0 = por %p500_p13, %p132_p1  ;;  %s653_s15 = sand.u32 1, %s2803_s20  }
  0xed   : > { %s2067_s16 = sshll.u32 %s2811_s1, 4  ;;  %s3529_s4 = sld [smem:[#allocation31_spill]] }
  0xee   : > { %s3528_s25 = scalar_select %p3186_p0, 1, 0 }
  0xef   : > { %s656_s3 = scalar_lea.vmem [#allocation7], %s653_s15  ;;  %p3202_p5 = pnand %p2346_p2, %p3163_p4 }
  0xf0   : > { %s663_s6 = sshll.u32 %s656_s3, 4  ;;  %s654_s17 = scalar_lea.sflag [#allocation8], %s653_s15  ;;  %s3198_s6 = int_to_ptr.vmem [resolvable:$true] %s663_s6 }
  0xf1   : > { %p2689_p7 = pneg %p3202_p5 }
  0xf3   : > { %s3196_s29 = scalar_lea.hbm %s3529_s4, %s2067_s16  ;;  %s2692_s5 = scalar_lea.hbm %s3529_s4, 32 }
  0xf4   : > { %s2687_s7 = scalar_lea.hbm %s3196_s29, 16  ;;  %p2693_p4 = scmp.lt.u32.totalorder %s3196_s29, %s3529_s4 }
  0xf5   : > { %p2688_p8 = scmp.ne.s32.totalorder %s3196_s29, %s2687_s7  ;;  %p2694_p6 = scmp.lt.u32.totalorder %s2692_s5, %s2687_s7 }
  0xf6   : > { %p2696_p10 = scmp.lt.u32.totalorder %s2687_s7, %s3196_s29 }
  0xf7   : > { %p2690_p9 = pnand %p2689_p7, %p2688_p8  ;;  %p2695_p3 = por %p2694_p6, %p2693_p4 }
  0xf9   : > { %p2691_p1 = pneg %p2690_p9  ;;  %p2697_p13 = por %p2696_p10, %p2695_p3 }
  0xfb   : > { %p2698_p2 = pnand %p2697_p13, %p2691_p1 }
  0xfd   : > { %2701 = shalt.err (!%p2698_p2)
}
  0xfe   : > { %s2702_s15 = scalar_lea.vmem %s3198_s6, 16  ;;  %s2827_s16 = smov [#allocation7]  }
  0xff   : > { %p2703_p8 = scmp.ne.s32.totalorder %s3198_s6, %s2702_s15  ;;  %s2707_s14 = sshll.u32 %s2827_s16, 4  ;;  %s2708_s14 = int_to_ptr.vmem [resolvable:$false] %s2707_s14 }
 0x100   : > { %s2709_s18 = scalar_lea.vmem %s2708_s14, 32  ;;  %p2710_p12 = scmp.lt.s32.totalorder %s3198_s6, %s2708_s14 }
 0x101   : > { %p2705_p9 = pnand %p2703_p8, %p2689_p7  ;;  %p2711_p4 = scmp.lt.s32.totalorder %s2709_s18, %s2702_s15 }
 0x103   : > { %p2706_p0 = pneg %p2705_p9  ;;  %p2712_p6 = por %p2711_p4, %p2710_p12 }
 0x105   : > { %p2713_p3 = pnand %p2712_p6, %p2706_p0 }
 0x107   : > { %2716 = shalt.err (!%p2713_p3)
}
 0x108   : > { %2333 = dma.hbm_to_vmem [thread:$0]  (!%p3202_p5), %s3196_s29, 16, %s3198_s6, %s654_s17  }
 0x109   : > { %p3531_p1 = scmp.ne.s32.totalorder %s3515_s24, 0 }
 0x10a   : > { %s3234_s7 = sand.u32 (!%p3531_p1), 1, %s2799_s30  }
 0x10b   : > { %672 = sbr.rel (%p3531_p1) target bundleno = 2912 (0xb60), region = 96  ;;  %s675_s5 = scalar_lea.sflag (!%p3531_p1), [#allocation8], %s3234_s7 }
 0x10c   : > { %s677_s3 = scalar_lea.vmem (!%p3531_p1), [#allocation7], %s3234_s7 }
 0x112   : > { %2770 = dma.done.wait (%p3175_p11), %s675_s5, 16  }
 0x113   : > { %2772 = vsyncadd (%p3175_p11), %s675_s5, 4294967280  ;;  %p3532_p12 = scmp.ne.s32.totalorder %s3514_s23, 0 }
 0x115   : > { %2774 = dma.done.wait (%p3532_p12), [#allocation11], 32  }
 0x116   : > { %2776 = vsyncadd (%p3532_p12), [#allocation11], 4294967264 }
 0x117   : > { %2778 = dma.done.wait (%p3532_p12), [#allocation14], 272  }
 0x118   : > { %2780 = vsyncadd (%p3532_p12), [#allocation14], 4294967024 }
 0x119   : > { %2782 = dma.done.wait (%p3532_p12), [#allocation17], 272  }
 0x11a   : > { %2784 = vsyncadd (%p3532_p12), [#allocation17], 4294967024 }
 0x11b   : > { %2786 = dma.done.wait (%p3532_p12), [#allocation20], 32  }
 0x11c   : > { %2788 = vsyncadd (%p3532_p12), [#allocation20], 4294967264  ;;  %p774_p11 = scmp.lt.s32.totalorder %s2807_s21, 1  ;;  %s3533_s28 = sld [smem:[#allocation30_spill]]  ;;  %vm797_vm0 = vcmask 261120   ;;  %v2422_v14 = vld [vmem:[#allocation13] sm:$0xff]  }
 0x11d   : > { %s3534_s14 = sld [smem:[#allocation29_spill]]  ;;  %v2423_v15 = vld [vmem:[%s3477_s9] sm:$0xff]   ;;  %v2828_v16 = vmov 0.0   ;;  %v2424_v17 = vld [vmem:[#allocation13 + $0x8] sm:$0xff]   ;;  %v2425_v18 = vld [vmem:[%s3477_s9 + $0x8] sm:$0xff]   ;;  %vm2829_vm1 = vmmov 0  }
 0x11e   : > { %s775_s24 = scalar_select %p774_p11, %s2807_s21, 1  ;;  %2169 = vmatprep.subr.bf16.mxu0 %v2828_v16  ;;  %2177 = vmatprep.subr.bf16.mxu1 %v2828_v16  ;;  %v2081_v28 = vld [vmem:[#allocation10] ss:$0 sm:$0xff]  ;;  %v2082_v39 = vld [vmem:[#allocation15] ss:$0 sm:$0xff]  ;;  %vm994_vm2 = vcmask 257024  }
 0x11f   : > { %2170 = vmatpush3.bf16.msra.mxu0 %v2422_v14  ;;  %2178 = vmatpush3.bf16.msra.mxu1 %v2423_v15  ;;  %s3536_s16 = sld [smem:[#allocation34_spill]]  ;;  %v2086_v40 = vld [vmem:[#allocation16] ss:$0 sm:$0xff]  ;;  %v2092_v52 = vld [vmem:[#allocation12] ss:$0 sm:$0xff]  ;;  %vm1111_vm3 = vcmask 1043456  }
 0x120   : > { %s2078_s27 = sshll.u32 %s775_s24, 3  ;;  %2171 = vmatprep.subr.bf16.mxu0 %v2828_v16  ;;  %2179 = vmatprep.subr.bf16.mxu1 %v2828_v16  ;;  %s2830_s23 = smov 120   ;;  %vm990_vm4 = vcmask 64512   ;;  %vm1215_vm6 = vcmask 60416   ;;  %vm1340_vm7 = vcmask 126016   ;;  %vm1462_vm8 = vcmask 191616  }
 0x121   : > { %2173 = vmatprep.mubr.msk.bf16.mxu0 %vm2829_vm1, %v2828_v16  ;;  %2181 = vmatprep.mubr.msk.bf16.mxu1 %vm2829_vm1, %v2828_v16  ;;  %s2831_s5 = smov 112   ;;  %s2832_s24 = smov 104   ;;  %vm1586_vm9 = vcmask 257216   ;;  %vm1804_vm10 = vcmask 523264  }
 0x122   : > { %s784_s17 = scalar_lea.vmem %s3533_s28, %s2078_s27  ;;  %s3535_s28 = sld [smem:[#allocation32_spill]] }
 0x123   : > { %s780_s18 = scalar_lea.vmem %s3534_s14, %s2078_s27  ;;  %v794_v0 = vld [vmem:[%s784_s17] sm:$0xff]  ;;  %2172 = vmatpush3.bf16.msra.mxu0 %v2424_v17  ;;  %2180 = vmatpush3.bf16.msra.mxu1 %v2425_v18  ;;  %s2834_s27 = smov 16  }
 0x124   : > { %v3266_v1 = vld [vmem:[%s780_s18] sm:$0xff]  ;;  %v798_v2 = vsel %vm797_vm0, %v794_v0, 0.0  ;;  %2185 = vmatprep.subr.bf16.mxu0 %v2828_v16  ;;  %2193 = vmatprep.subr.bf16.mxu1 %v2828_v16  ;;  %s2835_s29 = smov 24   ;;  %s3537_s17 = sld [smem:[#allocation41_spill]] }
 0x125   : > { %v1000_v3 = vsel %vm797_vm0, %v3266_v1, 0.0  ;;  %799 = vadd.xlane.f32.xlu0 %v798_v2  ;;  %v2426_v33 = vld [vmem:[%s3536_s16] sm:$0xff]   ;;  %v2427_v36 = vld [vmem:[%s3536_s16 + $0x8] sm:$0xff]   ;;  %s3538_s18 = sld [smem:[#allocation38_spill]]  ;;  %s2077_s6 = sshll.u32 %s3234_s7, 3 }
 0x126   : > { %s773_s15 = scalar_lea.vmem [#allocation22], %s2077_s6  ;;  %p3543_p5 = scmp.ne.s32.totalorder %s3527_s19, 0 }
 0x127   : > { %s1870_s14 = sshll.u32 %s773_s15, 4  ;;  %s3420_s14 = int_to_ptr.vmem [resolvable:$true] %s1870_s14 }
 0x128   : > { %v2080_v26 = vld [vmem:[%s3535_s28] ss:$0 sm:$0xff]  ;;  %s3540_s28 = sld [smem:[#allocation40_spill]] }
 0x129   : > { %1001 = vadd.xlane.f32.xlu0 %v1000_v3 }
 0x1b2   : > { %v800_v4 = vpop.xlane.xlu0 %799 }
 0x1b3   : > { %v802_v5 = vmul.f32 0.03125, %v800_v4 }
 0x1b5   : > { %v803_v6 = vsub.f32 %v794_v0, %v802_v5 }
 0x1b6   : > { %v1002_v7 = vpop.xlane.xlu0 %1001 }
 0x1b7   : > { %v1004_v8 = vmul.f32 0.03125, %v1002_v7  ;;  %v804_v9 = vmul.f32 %v803_v6, %v803_v6 }
 0x1b9   : > { %v1005_v10 = vsub.f32 %v3266_v1, %v1004_v8  ;;  %v805_v11 = vsel %vm797_vm0, %v804_v9, 0.0 }
 0x1ba   : > { %806 = vadd.xlane.f32.xlu1 %v805_v11 }
 0x1bb   : > { %v1006_v12 = vmul.f32 %v1005_v10, %v1005_v10 }
 0x1bd   : > { %v1007_v13 = vsel %vm797_vm0, %v1006_v12, 0.0 }
 0x1be   : > { %1008 = vadd.xlane.f32.xlu1 %v1007_v13 }
 0x247   : > { %v807_v19 = vpop.xlane.xlu1 %806 }
 0x248   : > { %v808_v20 = vmul.f32 0.03125, %v807_v19  ;;  %v1102_v19 = vlaneseq }
 0x24a   : > { %v809_v21 = vadd.f32 1e-06, %v808_v20  ;;  %v1097_v20 = vld [vmem:[%s677_s3] sm:$0x1]  ;;  %s2833_s3 = smov 8  }
 0x24b   : > { %v1009_v22 = vpop.xlane.xlu1 %1008  ;;  %vm1098_vm5 = vcmp.gt.f32.partialorder %v1097_v20, 0.0 }
 0x24c   : > { %2439 = vrsqrt.f32 %v809_v21  ;;  %v1010_v23 = vmul.f32 0.03125, %v1009_v22  ;;  %v1103_v21 = vshrl.u32 %v1102_v19, 7 }
 0x24e   : > { %v1011_v24 = vadd.f32 1e-06, %v1010_v23  ;;  %v1104_v22 = vsub.s32 0, %v1103_v21  ;;  %v1099_v23 = vsel %vm1098_vm5, -1e+18, %v2828_v16 }
 0x250   : > { %2441 = vrsqrt.f32 %v1011_v24  ;;  %v1105_v24 = vrot.slane %v1099_v23, %v1104_v22 }
 0x256   : > { %v2440_v25 = vpop.eup %2439 }
 0x257   : > { %v811_v27 = vmul.f32 %v2440_v25, %v803_v6 }
 0x259   : > { %v818_v29 = vmul.f32 %v2080_v26, %v811_v27 }
 0x25a   : > { %v2442_v30 = vpop.eup %2441 }
 0x25b   : > { %v1013_v31 = vmul.f32 %v2442_v30, %v1005_v10  ;;  %v825_v32 = vadd.f32 %v2081_v28, %v818_v29 }
 0x25d   : > { %v826_v34 = vpack.c.bf16 %v825_v32, %v825_v32  ;;  %v1020_v35 = vmul.f32 %v2080_v26, %v1013_v31 }
 0x25f   : > { %2174 = vmatmul.mubr.msk.bf16.vlgmr.msra.gmra.mrb[0].mxu0 %vm797_vm0, %v826_v34  ;;  %2182 = vmatmul.mubr.msk.bf16.vlgmr.msra.gmra.mrb[0].mxu1 %vm797_vm0, %v826_v34  ;;  %v1027_v37 = vadd.f32 %v2081_v28, %v1020_v35 }
 0x260   : > { %2186 = vmatpush3.bf16.msra.mxu0 %v2426_v33  ;;  %2189 = vmatprep.mubr.msk.bf16.mxu0 %vm2829_vm1, %v2828_v16 }
 0x261   : > { %2187 = vmatprep.subr.bf16.mxu0 %v2828_v16  ;;  %2195 = vmatprep.mubr.msk.bf16.mxu1 %vm2829_vm1, %v2828_v16  ;;  %v1028_v38 = vpack.c.bf16 %v1027_v37, %v1027_v37 }
 0x264   : > { %2188 = vmatpush3.bf16.msra.mxu0 %v2427_v36 }
 0x265   : > { %2199 = vmatprep.subr.bf16.mxu0 %v2828_v16 }
 0x267   : > { %2190 = vmatmul.mubr.msk.bf16.vlgmr.msra.gmra.mrb[4].mxu0 %vm797_vm0, %v1028_v38 }
 0x268   : > { %2201 = vmatprep.mubr.msk.bf16.mxu0 %vm2829_vm1, %v2828_v16 }
 0x332   : > { %v887_v41 = vpop.f32.mrb[0].mxu0  ;;  %v950_v42 = vpop.f32.mrb[0].mxu1 }
 0x333   : > { %v888_v43 = vadd.f32 %v2082_v39, %v887_v41  ;;  %v951_v44 = vadd.f32 %v2086_v40, %v950_v42  ;;  %v2175_v45 = vpop.f32.mrb[1].mxu0  ;;  %v2183_v46 = vpop.f32.mrb[1].mxu1 }
 0x334   : > { %v890_v47 = vpop.f32.mrb[2].mxu0  ;;  %v953_v48 = vpop.f32.mrb[2].mxu1 }
 0x335   : > { %v993_v49 = vpack.c.bf16 %v951_v44, %v951_v44  ;;  %v2184_v50 = vpop.f32.mrb[3].mxu1  ;;  %956 = vxpose.xlu0.b32.start.end [1/1] (short) (narrow) %v888_v43, 32  ;;  %v2176_v51 = vpop.f32.mrb[3].mxu0 }
 0x337   : > { %995 = vst.msk [vmem:[#allocation3] sm:$0xf] %vm994_vm2, %v993_v49 }
 0x33a   : > { %v1089_v53 = vpop.f32.mrb[4].mxu0 }
 0x33b   : > { %v1090_v54 = vadd.f32 %v2092_v52, %v1089_v53  ;;  %v2191_v55 = vpop.f32.mrb[5].mxu0 }
 0x33c   : > { %v1092_v56 = vpop.f32.mrb[6].mxu0 }
 0x33d   : > { %v1095_v57 = vmul.f32 0.35355338, %v1090_v54  ;;  %v2192_v58 = vpop.f32.mrb[7].mxu0 }
 0x33e   : > { %v1167_v59 = vld [vmem:[#allocation3] sm:$0xf] }
 0x33f   : > { %v1096_v60 = vpack.c.bf16 %v1095_v57, %v1095_v57  ;;  %v1172_v61 = vsel %vm1111_vm3, %v1167_v59, 0  ;;  %v2428_v49 = vld [vmem:[#allocation3] ss:$0 sps:$4 sm:$0xff]  }
 0x340   : > { %2200 = vmatpush3.bf16.msra.mxu0 %v1172_v61  ;;  %v2429_v55 = vld [vmem:[#allocation3] ss:$0 sps:$4 sm:$0xff]  }
 0x341   : > { %1219 = vrot.lane.b32.xlu1 %v1096_v60, %s2830_s23  ;;  %2211 = vmatprep.subr.bf16.mxu0 %v2828_v16 }
 0x345   : > { %1343 = vrot.lane.b32.xlu1 %v1096_v60, %s2831_s5 }
 0x349   : > { %1465 = vrot.lane.b32.xlu1 %v1096_v60, %s2832_s24 }
 0x3b3   : > { %v1220_v12 = vpop.permute.xlu1 %1219 }
 0x3b5   : > { %v972_v62 = vpop.trf.xlu0 }
 0x3b7   : > { %v1344_v17 = vpop.permute.xlu1 %1343 }
 0x3b9   : > { %v973_v63 = vpop.trf.xlu0 }
 0x3ba   : > { %v988_v0 = vpack.c.bf16 %v973_v63, %v972_v62 }
 0x3bb   : > { %v1466_v18 = vpop.permute.xlu1 %1465 }
 0x3bc   : > { %991 = vst.msk [vmem:[#allocation2] sm:$0xff] %vm990_vm4, %v988_v0 }
 0x3bd   : > { %v974_v2 = vpop.trf.xlu0 }
 0x3c1   : > { %v975_v3 = vpop.trf.xlu0 }
 0x3c2   : > { %v989_v4 = vpack.c.bf16 %v975_v3, %v974_v2 }
 0x3c3   : > { %v1100_v5 = vld [vmem:[#allocation2] sm:$0xf]  ;;  %v1217_v6 = vld [vmem:[#allocation2] sm:$0xf0] }
 0x3c4   : > { %v1113_v7 = vsel %vm1111_vm3, %v1100_v5, 0  ;;  %v1222_v8 = vrot.slane %v1217_v6, 4  ;;  %992 = vst.msk [vmem:[#allocation2 + $0x8] sm:$0xff] %vm990_vm4, %v989_v4 }
 0x3c5   : > { %2194 = vmatpush3.bf16.msra.mxu1 %v1113_v7 }
 0x3c6   : > { %2205 = vmatprep.subr.bf16.mxu1 %v2828_v16  ;;  %v1227_v9 = vsel %vm1111_vm3, %v1222_v8, 0  ;;  %v2430_v8 = vld [vmem:[#allocation3] ss:$0 sps:$4 sm:$0xff]  }
 0x3c8   : > { %2196 = vmatmul.mubr.msk.bf16.vlgmr.msra.gmra.mrb[4].mxu1 %vm990_vm4, %v1096_v60 }
 0x3c9   : > { %2206 = vmatpush3.bf16.msra.mxu1 %v1227_v9  ;;  %2207 = vmatprep.mubr.msk.bf16.mxu1 %vm2829_vm1, %v2828_v16 }
 0x3ca   : > { %2217 = vmatprep.subr.bf16.mxu1 %v2828_v16 }
 0x3cb   : > { %v1342_v10 = vld [vmem:[#allocation2 + $0x8] sm:$0xf]  ;;  %v1464_v13 = vld [vmem:[#allocation2 + $0x8] sm:$0xf0] }
 0x3cc   : > { %v1349_v11 = vsel %vm1111_vm3, %v1342_v10, 0  ;;  %v1468_v14 = vrot.slane %v1464_v13, 4 }
 0x3ce   : > { %v1473_v15 = vsel %vm1111_vm3, %v1468_v14, 0 }
 0x3d0   : > { %2208 = vmatmul.mubr.msk.bf16.vlgmr.msra.gmra.mrb[8].mxu1 %vm990_vm4, %v1220_v12 }
 0x3d1   : > { %2218 = vmatpush3.bf16.msra.mxu1 %v1349_v11  ;;  %2219 = vmatprep.mubr.msk.bf16.mxu1 %vm2829_vm1, %v2828_v16 }
 0x3d2   : > { %2229 = vmatprep.subr.bf16.mxu1 %v2828_v16 }
 0x3d8   : > { %2220 = vmatmul.mubr.msk.bf16.vlgmr.msra.gmra.mrb[12].mxu1 %vm990_vm4, %v1344_v17 }
 0x3d9   : > { %2230 = vmatpush3.bf16.msra.mxu1 %v1473_v15  ;;  %2231 = vmatprep.mubr.msk.bf16.mxu1 %vm2829_vm1, %v2828_v16 }
 0x3da   : > { %2241 = vmatprep.subr.bf16.mxu1 %v2828_v16 }
 0x3e0   : > { %2232 = vmatmul.mubr.msk.bf16.vlgmr.msra.gmra.mrb[16].mxu1 %vm990_vm4, %v1466_v18 }
 0x3e1   : > { %2245 = vmatprep.mubr.msk.bf16.mxu1 %vm2829_vm1, %v2828_v16 }
 0x49b   : > { %v1149_v25 = vpop.f32.mrb[4].mxu1 }
 0x49c   : > { %v1150_v26 = vadd.f32 %v1149_v25, %v1105_v24  ;;  %v2197_v27 = vpop.f32.mrb[5].mxu1 }
 0x49d   : > { %v1152_v28 = vpop.f32.mrb[6].mxu1 }
 0x49e   : > { %v2198_v29 = vpop.f32.mrb[7].mxu1  ;;  %v1155_v30 = vsel %vm990_vm4, %v1150_v26, -inf }
 0x49f   : > { %1156 = vmax.xlane.f32.xlu1 %v1155_v30 }
 0x4a3   : > { %v1263_v31 = vpop.f32.mrb[8].mxu1 }
 0x4a4   : > { %v1264_v32 = vadd.f32 %v1263_v31, %v1105_v24  ;;  %v2209_v33 = vpop.f32.mrb[9].mxu1 }
 0x4a5   : > { %v1266_v34 = vpop.f32.mrb[10].mxu1 }
 0x4a6   : > { %v2210_v35 = vpop.f32.mrb[11].mxu1  ;;  %v1269_v36 = vsel %vm990_vm4, %v1264_v32, -inf }
 0x4a7   : > { %1270 = vmax.xlane.f32.xlu0 %v1269_v36 }
 0x4ab   : > { %v1385_v37 = vpop.f32.mrb[12].mxu1 }
 0x4ac   : > { %v1386_v38 = vadd.f32 %v1385_v37, %v1105_v24  ;;  %v2221_v39 = vpop.f32.mrb[13].mxu1 }
 0x4ad   : > { %v1388_v40 = vpop.f32.mrb[14].mxu1 }
 0x4ae   : > { %v2222_v41 = vpop.f32.mrb[15].mxu1  ;;  %v1391_v42 = vsel %vm990_vm4, %v1386_v38, -inf }
 0x4af   : > { %1392 = vmax.xlane.f32.xlu1 %v1391_v42  ;;  %v2431_v42 = vld [vmem:[#allocation18] sm:$0xff]  }
 0x4b0   : > { %2242 = vmatpush3.bf16.msra.mxu1 %v2431_v42 }
 0x4b1   : > { %2243 = vmatprep.subr.bf16.mxu1 %v2828_v16 }
 0x4b3   : > { %v1509_v43 = vpop.f32.mrb[16].mxu1 }
 0x4b4   : > { %v1510_v44 = vadd.f32 %v1509_v43, %v1105_v24  ;;  %v2233_v45 = vpop.f32.mrb[17].mxu1 }
 0x4b5   : > { %v1512_v46 = vpop.f32.mrb[18].mxu1 }
 0x4b6   : > { %v2234_v47 = vpop.f32.mrb[19].mxu1  ;;  %v1515_v48 = vsel %vm990_vm4, %v1510_v44, -inf }
 0x4b7   : > { %1516 = vmax.xlane.f32.xlu1 %v1515_v48 }
 0x4bd   : > { %1407 = vrot.lane.b32.xlu0 %v2428_v49, %s2831_s5 }
 0x52c   : > { %v1157_v50 = vpop.xlane.xlu1 %1156 }
 0x52d   : > { %v1158_v51 = vsub.f32 %v1150_v26, %v1157_v50 }
 0x52f   : > { %v1159_v52 = vmul.f32 1.442695, %v1158_v51 }
 0x531   : > { %2443 = vpow2.f32 %v1159_v52 }
 0x534   : > { %v1271_v56 = vpop.xlane.xlu0 %1270 }
 0x535   : > { %v1272_v57 = vsub.f32 %v1264_v32, %v1271_v56 }
 0x537   : > { %v1273_v59 = vmul.f32 1.442695, %v1272_v57 }
 0x538   : > { %v1408_v21 = vpop.permute.xlu0 %1407 }
 0x539   : > { %2445 = vpow2.f32 %v1273_v59  ;;  %v1413_v24 = vsel %vm1111_vm3, %v1408_v21, 0 }
 0x53b   : > { %v2444_v53 = vpop.eup %2443 }
 0x53c   : > { %v1161_v54 = vsel %vm990_vm4, %v2444_v53, 0.0  ;;  %v1393_v58 = vpop.xlane.xlu1 %1392 }
 0x53d   : > { %1162 = vadd.xlane.f32.xlu1 %v1161_v54  ;;  %v1394_v60 = vsub.f32 %v1386_v38, %v1393_v58  ;;  %v2110_v58 = vld [vmem:[#allocation19] ss:$0 sm:$0xff] }
 0x53f   : > { %v1395_v62 = vmul.f32 1.442695, %v1394_v60 }
 0x541   : > { %2447 = vpow2.f32 %v1395_v62  ;;  %v2116_v62 = vld [vmem:[%s3537_s17] ss:$0 sm:$0xff]  ;;  %s2127_s17 = sshll.u32 %s2807_s21, 7  ;;  %s2836_s21 = smov [#allocation22]  }
 0x542   : > { %s2721_s6 = sshll.u32 %s2836_s21, 4  ;;  %s2722_s6 = int_to_ptr.vmem [resolvable:$false] %s2721_s6 }
 0x543   : > { %v2446_v2 = vpop.eup %2445  ;;  %p2724_p13 = scmp.lt.s32.totalorder %s3420_s14, %s2722_s6 }
 0x544   : > { %v1517_v61 = vpop.xlane.xlu1 %1516  ;;  %v1275_v3 = vsel %vm990_vm4, %v2446_v2, 0.0 }
 0x545   : > { %v1518_v63 = vsub.f32 %v1510_v44, %v1517_v61  ;;  %v2432_v44 = vld [vmem:[#allocation18 + $0x8] sm:$0xff]  }
 0x546   : > { %2244 = vmatpush3.bf16.msra.mxu1 %v2432_v44 }
 0x547   : > { %v1519_v0 = vmul.f32 1.442695, %v1518_v63  ;;  %2257 = vmatprep.subr.bf16.mxu1 %v2828_v16 }
 0x549   : > { %2449 = vpow2.f32 %v1519_v0 }
 0x54b   : > { %v2448_v4 = vpop.eup %2447 }
 0x54c   : > { %v1397_v5 = vsel %vm990_vm4, %v2448_v4, 0.0 }
 0x54e   : > { %1285 = vrot.lane.b32.xlu1 %v2429_v55, %s2830_s23  ;;  %s2723_s23 = scalar_lea.vmem %s2722_s6, 256 }
 0x553   : > { %v2450_v6 = vpop.eup %2449 }
 0x554   : > { %v1521_v7 = vsel %vm990_vm4, %v2450_v6, 0.0 }
 0x572   : > { %1276 = vadd.xlane.f32.xlu1 %v1275_v3 }
 0x576   : > { %1398 = vadd.xlane.f32.xlu1 %v1397_v5 }
 0x57a   : > { %1522 = vadd.xlane.f32.xlu1 %v1521_v7 }
 0x58b   : > { %1531 = vrot.lane.b32.xlu1 %v2430_v8, %s2832_s24  ;;  %s3542_s24 = sld [smem:[#allocation42_spill]] }
 0x5ca   : > { %v1163_v9 = vpop.xlane.xlu1 %1162 }
 0x5cb   : > { %2451 = vrcp.f32 %v1163_v9 }
 0x5ce   : > { %v1286_v12 = vpop.permute.xlu1 %1285 }
 0x5cf   : > { %v1291_v14 = vsel %vm1111_vm3, %v1286_v12, 0 }
 0x5d5   : > { %v2452_v10 = vpop.eup %2451 }
 0x5d6   : > { %v1165_v11 = vmul.f32 %v2452_v10, %v2444_v53  ;;  %v2433_v10 = vld [vmem:[%s3538_s18] sm:$0xff]  }
 0x5d8   : > { %v1166_v13 = vpack.c.bf16 %v1165_v11, %v1165_v11 }
 0x5da   : > { %2202 = vmatmul.mubr.msk.bf16.vlgmr.msra.gmra.mrb[8].mxu0 %vm990_vm4, %v1166_v13 }
 0x5db   : > { %2212 = vmatpush3.bf16.msra.mxu0 %v1291_v14  ;;  %2213 = vmatprep.mubr.msk.bf16.mxu0 %vm2829_vm1, %v2828_v16 }
 0x5dc   : > { %2223 = vmatprep.subr.bf16.mxu0 %v2828_v16 }
 0x5ff   : > { %v1277_v15 = vpop.xlane.xlu1 %1276 }
 0x600   : > { %2453 = vrcp.f32 %v1277_v15  ;;  %v2114_v15 = vld [vmem:[#allocation21] ss:$0 sm:$0xff] }
 0x603   : > { %v1399_v17 = vpop.xlane.xlu1 %1398 }
 0x604   : > { %2455 = vrcp.f32 %v1399_v17 }
 0x607   : > { %v1523_v18 = vpop.xlane.xlu1 %1522 }
 0x608   : > { %2457 = vrcp.f32 %v1523_v18 }
 0x60a   : > { %v2454_v19 = vpop.eup %2453 }
 0x60b   : > { %v1279_v20 = vmul.f32 %v2454_v19, %v2446_v2  ;;  %v1532_v26 = vpop.permute.xlu1 %1531 }
 0x60c   : > { %v1537_v29 = vsel %vm1111_vm3, %v1532_v26, 0  ;;  %v2438_v26 = vld [vmem:[%s3540_s28 + $0x18] sm:$0xff]  }
 0x60d   : > { %v1280_v22 = vpack.c.bf16 %v1279_v20, %v1279_v20 }
 0x60e   : > { %v2456_v23 = vpop.eup %2455 }
 0x60f   : > { %2214 = vmatmul.mubr.msk.bf16.vlgmr.msra.gmra.mrb[12].mxu0 %vm990_vm4, %v1280_v22  ;;  %v1401_v25 = vmul.f32 %v2456_v23, %v2448_v4  ;;  %v2435_v23 = vld [vmem:[%s3540_s28] sm:$0xff]  }
 0x610   : > { %2224 = vmatpush3.bf16.msra.mxu0 %v1413_v24  ;;  %2225 = vmatprep.mubr.msk.bf16.mxu0 %vm2829_vm1, %v2828_v16  ;;  %v2436_v24 = vld [vmem:[%s3540_s28 + $0x8] sm:$0xff]  }
 0x611   : > { %2235 = vmatprep.subr.bf16.mxu0 %v2828_v16  ;;  %v1402_v27 = vpack.c.bf16 %v1401_v25, %v1401_v25  ;;  %v2437_v25 = vld [vmem:[%s3540_s28 + $0x10] sm:$0xff]  }
 0x612   : > { %v2458_v28 = vpop.eup %2457 }
 0x613   : > { %v1525_v30 = vmul.f32 %v2458_v28, %v2450_v6 }
 0x615   : > { %v1526_v31 = vpack.c.bf16 %v1525_v30, %v1525_v30 }
 0x617   : > { %2226 = vmatmul.mubr.msk.bf16.vlgmr.msra.gmra.mrb[16].mxu0 %vm990_vm4, %v1402_v27 }
 0x618   : > { %2236 = vmatpush3.bf16.msra.mxu0 %v1537_v29  ;;  %2237 = vmatprep.mubr.msk.bf16.mxu0 %vm2829_vm1, %v2828_v16 }
 0x619   : > { %2249 = vmatprep.subr.bf16.mxu0 %v2828_v16 }
 0x61f   : > { %2238 = vmatmul.mubr.msk.bf16.vlgmr.msra.gmra.mrb[20].mxu0 %vm990_vm4, %v1526_v31 }
 0x620   : > { %2253 = vmatprep.mubr.msk.bf16.mxu0 %vm2829_vm1, %v2828_v16  ;;  %2250 = vmatpush3.bf16.msra.mxu0 %v2433_v10 }
 0x621   : > { %2251 = vmatprep.subr.bf16.mxu0 %v2828_v16 }
 0x6ad   : > { %v1208_v32 = vpop.f32.mrb[8].mxu0 }
 0x6ae   : > { %v1214_v33 = vpack.c.bf16 %v1208_v32, %v1208_v32  ;;  %v2203_v34 = vpop.f32.mrb[9].mxu0 }
 0x6af   : > { %v1211_v35 = vpop.f32.mrb[10].mxu0 }
 0x6b0   : > { %1216 = vst.msk [vmem:[#allocation4] sm:$0xf] %vm1215_vm6, %v1214_v33  ;;  %v2204_v36 = vpop.f32.mrb[11].mxu0 }
 0x6e2   : > { %v1327_v37 = vpop.f32.mrb[12].mxu0 }
 0x6e3   : > { %v2130_v38 = vpack.c.bf16 %v1327_v37, %v1327_v37  ;;  %v2215_v39 = vpop.f32.mrb[13].mxu0 }
 0x6e4   : > { %v1330_v40 = vpop.f32.mrb[14].mxu0 }
 0x6e5   : > { %1337 = vrot.lane.b32.xlu1 %v2130_v38, %s2833_s3  ;;  %v2216_v41 = vpop.f32.mrb[15].mxu0  ;;  %s3418_s3 = scalar_lea.hbm %s3542_s24, %s2127_s17 }
 0x6ea   : > { %v1449_v43 = vpop.f32.mrb[16].mxu0 }
 0x6eb   : > { %v2131_v45 = vpack.c.bf16 %v1449_v43, %v1449_v43  ;;  %v2227_v46 = vpop.f32.mrb[17].mxu0 }
 0x6ec   : > { %v1452_v47 = vpop.f32.mrb[18].mxu0 }
 0x6ed   : > { %1459 = vrot.lane.b32.xlu1 %v2131_v45, %s2834_s27  ;;  %v2228_v48 = vpop.f32.mrb[19].mxu0  ;;  %s3539_s27 = sld [smem:[#allocation37_spill]] }
 0x6f2   : > { %v1573_v49 = vpop.f32.mrb[20].mxu0 }
 0x6f3   : > { %v2132_v50 = vpack.c.bf16 %v1573_v49, %v1573_v49  ;;  %v2239_v51 = vpop.f32.mrb[21].mxu0  ;;  %v2115_v18 = vld [vmem:[%s3539_s27] ss:$0 sm:$0xff]  ;;  %s1856_s27 = scalar_lea.sflag [#allocation9], %s3234_s7 }
 0x6f4   : > { %v1576_v52 = vpop.f32.mrb[22].mxu0 }
 0x6f5   : > { %1583 = vrot.lane.b32.xlu1 %v2132_v50, %s2835_s29  ;;  %v2240_v53 = vpop.f32.mrb[23].mxu0  ;;  %s3541_s29 = sld [smem:[#allocation39_spill]] }
 0x6fb   : > { %v2117_v27 = vld [vmem:[%s3541_s29] ss:$0 sm:$0xff]  ;;  %s2717_s29 = scalar_lea.vmem %s3420_s14, 128 }
 0x6fc   : > { %p2718_p0 = scmp.ne.s32.totalorder %s3420_s14, %s2717_s29  ;;  %p2725_p2 = scmp.lt.s32.totalorder %s2723_s23, %s2717_s29 }
 0x6fe   : > { %p2719_p7 = pnand %p2718_p0, %p3543_p5  ;;  %p2726_p8 = por %p2725_p2, %p2724_p13 }
 0x700   : > { %p2720_p10 = pneg %p2719_p7 }
 0x702   : > { %p2727_p9 = pnand %p2726_p8, %p2720_p10 }
 0x757   : > { %v1338_v54 = vpop.permute.xlu1 %1337 }
 0x758   : > { %1341 = vst.msk [vmem:[#allocation4] sm:$0xf] %vm1340_vm7, %v1338_v54 }
 0x75f   : > { %v1460_v55 = vpop.permute.xlu1 %1459 }
 0x760   : > { %1463 = vst.msk [vmem:[#allocation4] sm:$0xf] %vm1462_vm8, %v1460_v55 }
 0x767   : > { %v1584_v56 = vpop.permute.xlu1 %1583 }
 0x768   : > { %1587 = vst.msk [vmem:[#allocation4] sm:$0xf] %vm1586_vm9, %v1584_v56 }
 0x76f   : > { %v1588_v57 = vld [vmem:[#allocation4] sm:$0xf] }
 0x770   : > { %2246 = vmatmul.mubr.msk.bf16.vlgmr.msra.gmra.mrb[20].mxu1 %vm797_vm0, %v1588_v57 }
 0x771   : > { %2265 = vmatprep.mubr.msk.bf16.mxu1 %vm2829_vm1, %v2828_v16  ;;  %2258 = vmatpush3.bf16.msra.mxu1 %v2435_v23 }
 0x772   : > { %2259 = vmatprep.subr.bf16.mxu1 %v2828_v16 }
 0x775   : > { %2260 = vmatpush3.bf16.msra.mxu1 %v2436_v24 }
 0x776   : > { %2261 = vmatprep.subr.bf16.mxu1 %v2828_v16 }
 0x779   : > { %2262 = vmatpush3.bf16.msra.mxu1 %v2437_v25 }
 0x77a   : > { %2263 = vmatprep.subr.bf16.mxu1 %v2828_v16 }
 0x77d   : > { %2264 = vmatpush3.bf16.msra.mxu1 %v2438_v26 }
 0x843   : > { %v1649_v59 = vpop.f32.mrb[20].mxu1 }
 0x844   : > { %v1650_v60 = vadd.f32 %v2110_v58, %v1649_v59  ;;  %v2247_v61 = vpop.f32.mrb[21].mxu1 }
 0x845   : > { %v1652_v63 = vpop.f32.mrb[22].mxu1 }
 0x846   : > { %v1655_v0 = vadd.f32 %v1650_v60, %v3266_v1  ;;  %v2248_v2 = vpop.f32.mrb[23].mxu1  ;;  %v2434_v1 = vld [vmem:[%s3538_s18 + $0x8] sm:$0xff]  }
 0x847   : > { %2252 = vmatpush3.bf16.msra.mxu0 %v2434_v1 }
 0x848   : > { %v1695_v3 = vadd.f32 %v2116_v62, %v1655_v0  ;;  %v1658_v4 = vsel %vm797_vm0, %v1655_v0, 0.0 }
 0x849   : > { %1659 = vadd.xlane.f32.xlu1 %v1658_v4 }
 0x84a   : > { %1696 = vst.msk [vmem:[#allocation6] sm:$0xff] %vm797_vm0, %v1695_v3 }
 0x851   : > { %v1770_v38 = vld [vmem:[#allocation6] sm:$0xff] }
 0x8d6   : > { %v1660_v5 = vpop.xlane.xlu1 %1659 }
 0x8d7   : > { %v1661_v6 = vmul.f32 0.03125, %v1660_v5 }
 0x8d9   : > { %v1662_v7 = vsub.f32 %v1655_v0, %v1661_v6 }
 0x8db   : > { %v1663_v8 = vmul.f32 %v1662_v7, %v1662_v7 }
 0x8dd   : > { %v1664_v9 = vsel %vm797_vm0, %v1663_v8, 0.0 }
 0x8de   : > { %1665 = vadd.xlane.f32.xlu0 %v1664_v9 }
 0x96b   : > { %v1666_v11 = vpop.xlane.xlu0 %1665 }
 0x96c   : > { %v1667_v12 = vmul.f32 0.03125, %v1666_v11 }
 0x96e   : > { %v1668_v13 = vadd.f32 1e-06, %v1667_v12 }
 0x970   : > { %2459 = vrsqrt.f32 %v1668_v13 }
 0x97a   : > { %v2460_v14 = vpop.eup %2459 }
 0x97b   : > { %v1670_v17 = vmul.f32 %v2460_v14, %v1662_v7 }
 0x97d   : > { %v1677_v19 = vmul.f32 %v2114_v15, %v1670_v17 }
 0x97f   : > { %v1684_v20 = vadd.f32 %v2115_v18, %v1677_v19 }
 0x981   : > { %v1685_v21 = vpack.c.bf16 %v1684_v20, %v1684_v20 }
 0x983   : > { %1687 = vst.msk [vmem:[#allocation5] sm:$0xf] %vm994_vm2, %v1685_v21 }
 0x98a   : > { %v1697_v22 = vld [vmem:[#allocation5] sm:$0xf] }
 0x98b   : > { %2254 = vmatmul.mubr.msk.bf16.vlgmr.msra.gmra.mrb[24].mxu0 %vm797_vm0, %v1697_v22 }
 0xa5e   : > { %v1759_v28 = vpop.f32.mrb[24].mxu0 }
 0xa5f   : > { %v1760_v29 = vadd.f32 %v2117_v27, %v1759_v28  ;;  %v2255_v30 = vpop.f32.mrb[25].mxu0 }
 0xa60   : > { %v1762_v31 = vpop.f32.mrb[26].mxu0 }
 0xa61   : > { %v1766_v32 = vmul.f32 0.70710677, %v1760_v29  ;;  %v2256_v33 = vpop.f32.mrb[27].mxu0  ;;  %v1765_v16 = vmul.f32 0.5, %v1760_v29 }
 0xa63   : > { %2461 = verf.f32 %v1766_v32 }
 0xa6d   : > { %v2462_v34 = vpop.eup %2461 }
 0xa6e   : > { %v1768_v35 = vadd.f32 1.0, %v2462_v34 }
 0xa70   : > { %v1769_v36 = vmul.f32 %v1768_v35, %v1765_v16 }
 0xa72   : > { %v1771_v37 = vpack.c.bf16 %v1769_v36, %v1769_v36 }
 0xa74   : > { %2266 = vmatmul.mubr.msk.bf16.vlgmr.msra.gmra.mrb[24].mxu1 %vm1804_vm10, %v1771_v37 }
 0xb47   : > { %v1842_v39 = vpop.f32.mrb[24].mxu1 }
 0xb48   : > { %v1848_v40 = vadd.f32 %v1842_v39, %v1770_v38  ;;  %v2267_v41 = vpop.f32.mrb[25].mxu1 }
 0xb49   : > { %v1845_v42 = vpop.f32.mrb[26].mxu1 }
 0xb4a   : > { %1849 = vst.msk [vmem:[#allocation6] sm:$0xff] %vm797_vm0, %v1848_v40  ;;  %v2268_v43 = vpop.f32.mrb[27].mxu1 }
 0xb51   : > { %v1853_v44 = vld [vmem:[#allocation6] sm:$0xff] }
 0xb52   : > { %1854 = vst.msk [vmem:[%s773_s15] sm:$0xff] %vm797_vm0, %v1853_v44 }
 0xb53   : > { %2730 = shalt.err (!%p2727_p9)
}
 0xb54   : > { %s2731_s7 = scalar_lea.hbm %s3418_s3, 128  ;;  %s2735_s5 = scalar_lea.hbm %s3542_s24, 256 }
 0xb55   : > { %p2732_p4 = scmp.ne.s32.totalorder %s3418_s3, %s2731_s7  ;;  %p2736_p1 = scmp.lt.u32.totalorder %s3418_s3, %s3542_s24 }
 0xb56   : > { %p2737_p12 = scmp.lt.u32.totalorder %s2735_s5, %s2731_s7  ;;  %p2739_p0 = scmp.lt.u32.totalorder %s2731_s7, %s3418_s3 }
 0xb57   : > { %p2733_p6 = pnand %p2732_p4, %p3543_p5 }
 0xb58   : > { %p2738_p11 = por %p2737_p12, %p2736_p1 }
 0xb59   : > { %p2734_p3 = pneg %p2733_p6 }
 0xb5a   : > { %p2740_p7 = por %p2739_p0, %p2738_p11 }
 0xb5c   : > { %p2741_p10 = pnand %p2740_p7, %p2734_p3 }
 0xb5e   : > { %2744 = shalt.err (!%p2741_p10)
}
 0xb5f   : > { %2303 = dma.vmem_to_hbm [thread:$0]  (%p3543_p5), %s3420_s14, 128, %s3418_s3, %s1856_s27  }
 0xb60 PF: > { %s1882_s29 = sand.u32 1, %s2795_s0   ;;  %p3544_p13 = scmp.ne.s32.totalorder %s3528_s25, 0 }
 0xb61   : > { %p3545_p2 = scmp.ge.s32.totalorder %s2815_s22, 2  ;;  %s1883_s23 = scalar_lea.sflag [#allocation9], %s1882_s29 }
 0xb63   : > { %p2335_p8 = pnand %p3545_p2, %p3544_p13 }
 0xb65   : > { %2790 = dma.done.wait (!%p2335_p8), %s1883_s23, 128  }
 0xb66   : > { %2792 = vsyncadd (!%p2335_p8), %s1883_s23, 4294967168  ;;  %s39_s22 = sadd.s32 1, %s2815_s22   ;;  %s3546_s0 = smov %s2799_s30 }
 0xb67   : > { %p36_p9 = scmp.ge.s32.totalorder %s39_s22, 4   ;;  %s3547_s30 = smov %s2803_s20 }
 0xb68   : > { %s3548_s20 = smov %s3184_s2  ;;  %s3549_s21 = smov %s2811_s1 }
 0xb69   : > { %s3550_s1 = smov %s3552_s26  ;;  %38 = sbr.rel (!%p36_p9) target bundleno = 25 (0x19), region = 191 }
 0xb70   :  { %1888 = vsyncpa [#allocation8], 1 }
 0xb71   :  { %1890 = vsyncpa [#allocation8 + $0x1], 1 }
 0xb72   :  { %1891 = vsyncpa [#allocation11], 1 }
 0xb73   :  { %1892 = vsyncpa [#allocation14], 1 }
 0xb74   :  { %1893 = vsyncpa [#allocation17], 1 }
 0xb75   :  { %1894 = vsyncpa [#allocation20], 1 }
 0xb76   :  { %1895 = vsyncpa [#allocation9], 1 }
 0xb77   :  { %1897 = vsyncpa [#allocation9 + $0x1], 1 }

</bundles_post_ra>
